<compile_context>
chip_gen: v7x
topology: tpu7x:2x2x1
jax: 0.10.0
libtpu: 0.0.40
codegen_flags: <defaults>
</compile_context>

<pallas_src>
import jax
import jax.numpy as jnp
from jax import lax
from jax.experimental import pallas as pl
from jax.experimental.pallas import tpu as pltpu


def _mhfa_kernel(x_ref, ww_ref, bw_ref, wv_ref, bv_ref, gamma_ref, beta_ref, o_ref):
    h_dim, f_dim, tb = x_ref.shape          # (H, F, TB): batch tile on lanes
    nh = wv_ref.shape[1]

    # Per-hidden-channel (F, TB) slabs: features on sublanes, batch on lanes.
    x_ch = [x_ref[h] for h in range(h_dim)]

    # u = tanh(x @ W_w + b_w): unrolled scalar-broadcast FMAs (VPU); weights in SMEM.
    u_ch = []
    for o in range(h_dim):
        acc = x_ch[0] * ww_ref[0, o]
        for i in range(1, h_dim):
            acc = acc + x_ch[i] * ww_ref[i, o]
        u_ch.append(jnp.tanh(acc + bw_ref[o]))

    # Attention logits s = u @ W_v + b_v : NH channels of (F, TB).
    s_ch = []
    for n in range(nh):
        acc = u_ch[0] * wv_ref[0, n]
        for i in range(1, h_dim):
            acc = acc + u_ch[i] * wv_ref[i, n]
        s_ch.append(acc + bv_ref[n])

    # Softmax over the feature axis (sublane reduce), per head channel.
    a_ch = []
    for n in range(nh):
        s = s_ch[n]
        m = jnp.max(s, axis=0, keepdims=True)
        e = jnp.exp(s - m)
        denom = jnp.sum(e, axis=0, keepdims=True)
        r = pl.reciprocal(denom, approx=True)      # EUP
        r = r * (2.0 - denom * r)                  # one Newton step -> ~exact f32
        a_ch.append(e * r)

    # weighted_x = sum over heads of u_split * attn.
    if nh == h_dim:                     # head_dim == 1: (F, TB), broadcast over hidden
        w = u_ch[0] * a_ch[0]
        for n in range(1, nh):
            w = w + u_ch[n] * a_ch[n]
        w_ch = [w] * h_dim
    elif nh == 1:                       # single head: per hidden channel
        w_ch = [u_ch[h] * a_ch[0] for h in range(h_dim)]
    else:                               # unreachable: validated in the wrapper
        raise ValueError("head_dim == 1 or num_heads == 1 required")

    # Residual gate. dropout(p=0.1) is the identity in eval mode.
    # TODO(synk): training-mode stochastic dropout (PRNG masking) not implemented.
    y_ch = [x_ch[h] + x_ch[h] * w_ch[h] for h in range(h_dim)]

    # LayerNorm over the hidden axis (eps=1e-5, biased variance, affine).
    inv_h = 1.0 / h_dim
    mu = y_ch[0]
    for h in range(1, h_dim):
        mu = mu + y_ch[h]
    mu = mu * inv_h
    var = jnp.square(y_ch[0] - mu)
    for h in range(1, h_dim):
        var = var + jnp.square(y_ch[h] - mu)
    var = var * inv_h
    inv_std = lax.rsqrt(var + 1e-5)
    for h in range(h_dim):
        o_ref[h] = (y_ch[h] - mu) * inv_std * gamma_ref[h] + beta_ref[h]


def mhfa_forward(x, params, *, block_b=None):
    B, F, H = x.shape
    NH = params["w_v"].shape[1]
    assert H % NH == 0, "hidden_dim must be divisible by num_heads"
    head_dim = H // NH
    if not (head_dim == 1 or NH == 1):
        raise ValueError("module forward only supports head_dim==1 or num_heads==1")
    if H > 32:
        raise ValueError("unrolled VPU path targets small hidden dims (H <= 32)")

    # Channel-major relayout: (B, F, H) -> (H, F, B) so batch sits on lanes.
    x_cm = jnp.transpose(x.astype(jnp.float32), (2, 1, 0))

    # Batch (lane) tile: small B -> single grid step, no padding; large B ->
    # 128-lane-multiple tiles (pad fraction is small).
    if block_b is None:
        block_b = B if B <= 1024 else 512
    if block_b >= B:
        block_b, Bp = B, B
    else:
        block_b = max(128, (block_b // 128) * 128)
        Bp = pl.cdiv(B, block_b) * block_b
        if Bp != B:
            x_cm = jnp.pad(x_cm, ((0, 0), (0, 0), (0, Bp - B)))
    grid_b = Bp // block_b

    tokens = Bp * F
    flops = tokens * (2 * H * H + 2 * H * NH + 8 * NH + 10 * H)
    transcendentals = tokens * (H + 2 * NH) + Bp * NH
    bytes_accessed = 4 * (2 * Bp * F * H + H * H + H * NH + 4 * H + NH)

    def smem_spec():
        return pl.BlockSpec(memory_space=pltpu.MemorySpace.SMEM)

    out_cm = pl.pallas_call(
        _mhfa_kernel,
        out_shape=jax.ShapeDtypeStruct((H, F, Bp), jnp.float32),
        grid=(grid_b,),
        in_specs=[
            pl.BlockSpec((H, F, block_b), lambda i: (0, 0, i)),   # x, channel-major tile
            smem_spec(),   # W_w   (H, H)  scalar weights
            smem_spec(),   # b_w   (H,)
            smem_spec(),   # W_v   (H, NH)
            smem_spec(),   # b_v   (NH,)
            smem_spec(),   # gamma (H,)
            smem_spec(),   # beta  (H,)
        ],
        out_specs=pl.BlockSpec((H, F, block_b), lambda i: (0, 0, i)),
        compiler_params=pltpu.CompilerParams(
            dimension_semantics=("parallel",)),
        cost_estimate=pl.CostEstimate(
            flops=int(flops),
            transcendentals=int(transcendentals),
            bytes_accessed=int(bytes_accessed)),
    )(x_cm, params["w_w"], params["b_w"], params["w_v"], params["b_v"],
      params["gamma"], params["beta"])

    return jnp.transpose(out_cm[:, :, :B], (2, 1, 0))


def init_params(key, hidden_dim, num_heads):
    """Deterministic synthetic parameters (PyTorch Linear weights pre-transposed to (in, out))."""
    ks = jax.random.split(key, 6)
    w_w = jax.random.normal(ks[0], (hidden_dim, hidden_dim), jnp.float32) / jnp.sqrt(hidden_dim)
    b_w = 0.1 * jax.random.normal(ks[1], (hidden_dim,), jnp.float32)
    w_v = jax.random.normal(ks[2], (hidden_dim, num_heads), jnp.float32) / jnp.sqrt(hidden_dim)
    b_v = 0.1 * jax.random.normal(ks[3], (num_heads,), jnp.float32)
    gamma = 1.0 + 0.1 * jax.random.normal(ks[4], (hidden_dim,), jnp.float32)
    beta = 0.1 * jax.random.normal(ks[5], (hidden_dim,), jnp.float32)
    return {"w_w": w_w, "b_w": b_w, "w_v": w_v, "b_v": b_v, "gamma": gamma, "beta": beta}


def reference_forward(x, p, num_heads):
    """Pure-JAX mirror of the PyTorch forward (eval mode), f32-exact matmuls."""
    B, F, H = x.shape
    hd = H // num_heads
    u = jnp.tanh(jnp.einsum("bfh,hk->bfk", x, p["w_w"],
                            precision=lax.Precision.HIGHEST) + p["b_w"])
    logits = jnp.einsum("bfk,kn->bfn", u, p["w_v"],
                        precision=lax.Precision.HIGHEST) + p["b_v"]
    attn = jax.nn.softmax(logits, axis=1)                        # softmax over features
    u4 = u.reshape(B, F, num_heads, hd)
    a4 = attn.reshape(B, F, num_heads, 1)
    weighted = jnp.sum(u4 * a4, axis=2)                          # (B, F, hd)
    y = x + x * weighted                                         # valid configs only
    mu = jnp.mean(y, axis=-1, keepdims=True)
    var = jnp.mean((y - mu) ** 2, axis=-1, keepdims=True)
    return (y - mu) / jnp.sqrt(var + 1e-5) * p["gamma"] + p["beta"]


if __name__ == "__main__":
    key = jax.random.PRNGKey(0)
    k_x, k_p = jax.random.split(key)

    batch = 10           # NOT a power of two / lane multiple: exercises the no-pad single-step path
    num_features = 8
    num_heads = 7        # module default
    hidden_dim = 7       # head_dim = 1: the only hidden size the default forward supports

    x = jax.random.normal(k_x, (batch, num_features, hidden_dim), jnp.float32)
    params = init_params(k_p, hidden_dim, num_heads)

    out = mhfa_forward(x, params)
    out = jax.block_until_ready(out)

    ref = reference_forward(x, params, num_heads)
    assert out.shape == (batch, num_features, hidden_dim)
    max_err = float(jnp.max(jnp.abs(out - ref)))
    assert jnp.allclose(out, ref, atol=1e-4, rtol=1e-4), max_err

    print("KERNEL_OK")
</pallas_src>

<mosaic_0001>
module attributes {stable_mosaic.version = 11 : i64} {
  func.func @_mhfa_kernel(%arg0: i32, %arg1: memref<7x8x10xf32, #tpu.memory_space<vmem>>, %arg2: memref<7x7xf32, #tpu.memory_space<smem>>, %arg3: memref<7xf32, #tpu.memory_space<smem>>, %arg4: memref<7x7xf32, #tpu.memory_space<smem>>, %arg5: memref<7xf32, #tpu.memory_space<smem>>, %arg6: memref<7xf32, #tpu.memory_space<smem>>, %arg7: memref<7xf32, #tpu.memory_space<smem>>, %arg8: memref<7x8x10xf32, #tpu.memory_space<vmem>>) attributes {dimension_semantics = [#tpu.dimension_semantics<parallel>], iteration_bounds = array<i64: 1>, scalar_prefetch = 0 : i64, scratch_operands = 0 : i64, tpu.core_type = #tpu.core_type<tc>, window_params = [{transform_indices = @transform_0, window_bounds = array<i64: 7, 8, 10>}, {transform_indices = @transform_1, window_bounds = array<i64: 7, 7>}, {transform_indices = @transform_2, window_bounds = array<i64: 7>}, {transform_indices = @transform_3, window_bounds = array<i64: 7, 7>}, {transform_indices = @transform_4, window_bounds = array<i64: 7>}, {transform_indices = @transform_5, window_bounds = array<i64: 7>}, {transform_indices = @transform_6, window_bounds = array<i64: 7>}, {transform_indices = @transform_7, window_bounds = array<i64: 7, 8, 10>}]} {
    %c0 = arith.constant 0 : index
    %c0_0 = arith.constant 0 : index
    %c0_1 = arith.constant 0 : index
    %0 = vector.load %arg1[%c0, %c0_0, %c0_1] : memref<7x8x10xf32, #tpu.memory_space<vmem>>, vector<1x8x10xf32>
    %1 = vector.shape_cast %0 : vector<1x8x10xf32> to vector<8x10xf32>
    %c1 = arith.constant 1 : index
    %c0_2 = arith.constant 0 : index
    %c0_3 = arith.constant 0 : index
    %2 = vector.load %arg1[%c1, %c0_2, %c0_3] : memref<7x8x10xf32, #tpu.memory_space<vmem>>, vector<1x8x10xf32>
    %3 = vector.shape_cast %2 : vector<1x8x10xf32> to vector<8x10xf32>
    %c2 = arith.constant 2 : index
    %c0_4 = arith.constant 0 : index
    %c0_5 = arith.constant 0 : index
    %4 = vector.load %arg1[%c2, %c0_4, %c0_5] : memref<7x8x10xf32, #tpu.memory_space<vmem>>, vector<1x8x10xf32>
    %5 = vector.shape_cast %4 : vector<1x8x10xf32> to vector<8x10xf32>
    %c3 = arith.constant 3 : index
    %c0_6 = arith.constant 0 : index
    %c0_7 = arith.constant 0 : index
    %6 = vector.load %arg1[%c3, %c0_6, %c0_7] : memref<7x8x10xf32, #tpu.memory_space<vmem>>, vector<1x8x10xf32>
    %7 = vector.shape_cast %6 : vector<1x8x10xf32> to vector<8x10xf32>
    %c4 = arith.constant 4 : index
    %c0_8 = arith.constant 0 : index
    %c0_9 = arith.constant 0 : index
    %8 = vector.load %arg1[%c4, %c0_8, %c0_9] : memref<7x8x10xf32, #tpu.memory_space<vmem>>, vector<1x8x10xf32>
    %9 = vector.shape_cast %8 : vector<1x8x10xf32> to vector<8x10xf32>
    %c5 = arith.constant 5 : index
    %c0_10 = arith.constant 0 : index
    %c0_11 = arith.constant 0 : index
    %10 = vector.load %arg1[%c5, %c0_10, %c0_11] : memref<7x8x10xf32, #tpu.memory_space<vmem>>, vector<1x8x10xf32>
    %11 = vector.shape_cast %10 : vector<1x8x10xf32> to vector<8x10xf32>
    %c6 = arith.constant 6 : index
    %c0_12 = arith.constant 0 : index
    %c0_13 = arith.constant 0 : index
    %12 = vector.load %arg1[%c6, %c0_12, %c0_13] : memref<7x8x10xf32, #tpu.memory_space<vmem>>, vector<1x8x10xf32>
    %13 = vector.shape_cast %12 : vector<1x8x10xf32> to vector<8x10xf32>
    %c0_14 = arith.constant 0 : index
    %c0_15 = arith.constant 0 : index
    %14 = memref.load %arg2[%c0_14, %c0_15] : memref<7x7xf32, #tpu.memory_space<smem>>
    %15 = vector.broadcast %14 : f32 to vector<8x10xf32>
    %16 = arith.mulf %1, %15 : vector<8x10xf32>
    %c1_16 = arith.constant 1 : index
    %c0_17 = arith.constant 0 : index
    %17 = memref.load %arg2[%c1_16, %c0_17] : memref<7x7xf32, #tpu.memory_space<smem>>
    %18 = vector.broadcast %17 : f32 to vector<8x10xf32>
    %19 = arith.mulf %3, %18 : vector<8x10xf32>
    %20 = arith.addf %16, %19 : vector<8x10xf32>
    %c2_18 = arith.constant 2 : index
    %c0_19 = arith.constant 0 : index
    %21 = memref.load %arg2[%c2_18, %c0_19] : memref<7x7xf32, #tpu.memory_space<smem>>
    %22 = vector.broadcast %21 : f32 to vector<8x10xf32>
    %23 = arith.mulf %5, %22 : vector<8x10xf32>
    %24 = arith.addf %20, %23 : vector<8x10xf32>
    %c3_20 = arith.constant 3 : index
    %c0_21 = arith.constant 0 : index
    %25 = memref.load %arg2[%c3_20, %c0_21] : memref<7x7xf32, #tpu.memory_space<smem>>
    %26 = vector.broadcast %25 : f32 to vector<8x10xf32>
    %27 = arith.mulf %7, %26 : vector<8x10xf32>
    %28 = arith.addf %24, %27 : vector<8x10xf32>
    %c4_22 = arith.constant 4 : index
    %c0_23 = arith.constant 0 : index
    %29 = memref.load %arg2[%c4_22, %c0_23] : memref<7x7xf32, #tpu.memory_space<smem>>
    %30 = vector.broadcast %29 : f32 to vector<8x10xf32>
    %31 = arith.mulf %9, %30 : vector<8x10xf32>
    %32 = arith.addf %28, %31 : vector<8x10xf32>
    %c5_24 = arith.constant 5 : index
    %c0_25 = arith.constant 0 : index
    %33 = memref.load %arg2[%c5_24, %c0_25] : memref<7x7xf32, #tpu.memory_space<smem>>
    %34 = vector.broadcast %33 : f32 to vector<8x10xf32>
    %35 = arith.mulf %11, %34 : vector<8x10xf32>
    %36 = arith.addf %32, %35 : vector<8x10xf32>
    %c6_26 = arith.constant 6 : index
    %c0_27 = arith.constant 0 : index
    %37 = memref.load %arg2[%c6_26, %c0_27] : memref<7x7xf32, #tpu.memory_space<smem>>
    %38 = vector.broadcast %37 : f32 to vector<8x10xf32>
    %39 = arith.mulf %13, %38 : vector<8x10xf32>
    %40 = arith.addf %36, %39 : vector<8x10xf32>
    %c0_28 = arith.constant 0 : index
    %41 = memref.load %arg3[%c0_28] : memref<7xf32, #tpu.memory_space<smem>>
    %42 = vector.broadcast %41 : f32 to vector<8x10xf32>
    %43 = arith.addf %40, %42 : vector<8x10xf32>
    %44 = math.tanh %43 : vector<8x10xf32>
    %c0_29 = arith.constant 0 : index
    %c1_30 = arith.constant 1 : index
    %45 = memref.load %arg2[%c0_29, %c1_30] : memref<7x7xf32, #tpu.memory_space<smem>>
    %46 = vector.broadcast %45 : f32 to vector<8x10xf32>
    %47 = arith.mulf %1, %46 : vector<8x10xf32>
    %c1_31 = arith.constant 1 : index
    %c1_32 = arith.constant 1 : index
    %48 = memref.load %arg2[%c1_31, %c1_32] : memref<7x7xf32, #tpu.memory_space<smem>>
    %49 = vector.broadcast %48 : f32 to vector<8x10xf32>
    %50 = arith.mulf %3, %49 : vector<8x10xf32>
    %51 = arith.addf %47, %50 : vector<8x10xf32>
    %c2_33 = arith.constant 2 : index
    %c1_34 = arith.constant 1 : index
    %52 = memref.load %arg2[%c2_33, %c1_34] : memref<7x7xf32, #tpu.memory_space<smem>>
    %53 = vector.broadcast %52 : f32 to vector<8x10xf32>
    %54 = arith.mulf %5, %53 : vector<8x10xf32>
    %55 = arith.addf %51, %54 : vector<8x10xf32>
    %c3_35 = arith.constant 3 : index
    %c1_36 = arith.constant 1 : index
    %56 = memref.load %arg2[%c3_35, %c1_36] : memref<7x7xf32, #tpu.memory_space<smem>>
    %57 = vector.broadcast %56 : f32 to vector<8x10xf32>
    %58 = arith.mulf %7, %57 : vector<8x10xf32>
    %59 = arith.addf %55, %58 : vector<8x10xf32>
    %c4_37 = arith.constant 4 : index
    %c1_38 = arith.constant 1 : index
    %60 = memref.load %arg2[%c4_37, %c1_38] : memref<7x7xf32, #tpu.memory_space<smem>>
    %61 = vector.broadcast %60 : f32 to vector<8x10xf32>
    %62 = arith.mulf %9, %61 : vector<8x10xf32>
    %63 = arith.addf %59, %62 : vector<8x10xf32>
    %c5_39 = arith.constant 5 : index
    %c1_40 = arith.constant 1 : index
    %64 = memref.load %arg2[%c5_39, %c1_40] : memref<7x7xf32, #tpu.memory_space<smem>>
    %65 = vector.broadcast %64 : f32 to vector<8x10xf32>
    %66 = arith.mulf %11, %65 : vector<8x10xf32>
    %67 = arith.addf %63, %66 : vector<8x10xf32>
    %c6_41 = arith.constant 6 : index
    %c1_42 = arith.constant 1 : index
    %68 = memref.load %arg2[%c6_41, %c1_42] : memref<7x7xf32, #tpu.memory_space<smem>>
    %69 = vector.broadcast %68 : f32 to vector<8x10xf32>
    %70 = arith.mulf %13, %69 : vector<8x10xf32>
    %71 = arith.addf %67, %70 : vector<8x10xf32>
    %c1_43 = arith.constant 1 : index
    %72 = memref.load %arg3[%c1_43] : memref<7xf32, #tpu.memory_space<smem>>
    %73 = vector.broadcast %72 : f32 to vector<8x10xf32>
    %74 = arith.addf %71, %73 : vector<8x10xf32>
    %75 = math.tanh %74 : vector<8x10xf32>
    %c0_44 = arith.constant 0 : index
    %c2_45 = arith.constant 2 : index
    %76 = memref.load %arg2[%c0_44, %c2_45] : memref<7x7xf32, #tpu.memory_space<smem>>
    %77 = vector.broadcast %76 : f32 to vector<8x10xf32>
    %78 = arith.mulf %1, %77 : vector<8x10xf32>
    %c1_46 = arith.constant 1 : index
    %c2_47 = arith.constant 2 : index
    %79 = memref.load %arg2[%c1_46, %c2_47] : memref<7x7xf32, #tpu.memory_space<smem>>
    %80 = vector.broadcast %79 : f32 to vector<8x10xf32>
    %81 = arith.mulf %3, %80 : vector<8x10xf32>
    %82 = arith.addf %78, %81 : vector<8x10xf32>
    %c2_48 = arith.constant 2 : index
    %c2_49 = arith.constant 2 : index
    %83 = memref.load %arg2[%c2_48, %c2_49] : memref<7x7xf32, #tpu.memory_space<smem>>
    %84 = vector.broadcast %83 : f32 to vector<8x10xf32>
    %85 = arith.mulf %5, %84 : vector<8x10xf32>
    %86 = arith.addf %82, %85 : vector<8x10xf32>
    %c3_50 = arith.constant 3 : index
    %c2_51 = arith.constant 2 : index
    %87 = memref.load %arg2[%c3_50, %c2_51] : memref<7x7xf32, #tpu.memory_space<smem>>
    %88 = vector.broadcast %87 : f32 to vector<8x10xf32>
    %89 = arith.mulf %7, %88 : vector<8x10xf32>
    %90 = arith.addf %86, %89 : vector<8x10xf32>
    %c4_52 = arith.constant 4 : index
    %c2_53 = arith.constant 2 : index
    %91 = memref.load %arg2[%c4_52, %c2_53] : memref<7x7xf32, #tpu.memory_space<smem>>
    %92 = vector.broadcast %91 : f32 to vector<8x10xf32>
    %93 = arith.mulf %9, %92 : vector<8x10xf32>
    %94 = arith.addf %90, %93 : vector<8x10xf32>
    %c5_54 = arith.constant 5 : index
    %c2_55 = arith.constant 2 : index
    %95 = memref.load %arg2[%c5_54, %c2_55] : memref<7x7xf32, #tpu.memory_space<smem>>
    %96 = vector.broadcast %95 : f32 to vector<8x10xf32>
    %97 = arith.mulf %11, %96 : vector<8x10xf32>
    %98 = arith.addf %94, %97 : vector<8x10xf32>
    %c6_56 = arith.constant 6 : index
    %c2_57 = arith.constant 2 : index
    %99 = memref.load %arg2[%c6_56, %c2_57] : memref<7x7xf32, #tpu.memory_space<smem>>
    %100 = vector.broadcast %99 : f32 to vector<8x10xf32>
    %101 = arith.mulf %13, %100 : vector<8x10xf32>
    %102 = arith.addf %98, %101 : vector<8x10xf32>
    %c2_58 = arith.constant 2 : index
    %103 = memref.load %arg3[%c2_58] : memref<7xf32, #tpu.memory_space<smem>>
    %104 = vector.broadcast %103 : f32 to vector<8x10xf32>
    %105 = arith.addf %102, %104 : vector<8x10xf32>
    %106 = math.tanh %105 : vector<8x10xf32>
    %c0_59 = arith.constant 0 : index
    %c3_60 = arith.constant 3 : index
    %107 = memref.load %arg2[%c0_59, %c3_60] : memref<7x7xf32, #tpu.memory_space<smem>>
    %108 = vector.broadcast %107 : f32 to vector<8x10xf32>
    %109 = arith.mulf %1, %108 : vector<8x10xf32>
    %c1_61 = arith.constant 1 : index
    %c3_62 = arith.constant 3 : index
    %110 = memref.load %arg2[%c1_61, %c3_62] : memref<7x7xf32, #tpu.memory_space<smem>>
    %111 = vector.broadcast %110 : f32 to vector<8x10xf32>
    %112 = arith.mulf %3, %111 : vector<8x10xf32>
    %113 = arith.addf %109, %112 : vector<8x10xf32>
    %c2_63 = arith.constant 2 : index
    %c3_64 = arith.constant 3 : index
    %114 = memref.load %arg2[%c2_63, %c3_64] : memref<7x7xf32, #tpu.memory_space<smem>>
    %115 = vector.broadcast %114 : f32 to vector<8x10xf32>
    %116 = arith.mulf %5, %115 : vector<8x10xf32>
    %117 = arith.addf %113, %116 : vector<8x10xf32>
    %c3_65 = arith.constant 3 : index
    %c3_66 = arith.constant 3 : index
    %118 = memref.load %arg2[%c3_65, %c3_66] : memref<7x7xf32, #tpu.memory_space<smem>>
    %119 = vector.broadcast %118 : f32 to vector<8x10xf32>
    %120 = arith.mulf %7, %119 : vector<8x10xf32>
    %121 = arith.addf %117, %120 : vector<8x10xf32>
    %c4_67 = arith.constant 4 : index
    %c3_68 = arith.constant 3 : index
    %122 = memref.load %arg2[%c4_67, %c3_68] : memref<7x7xf32, #tpu.memory_space<smem>>
    %123 = vector.broadcast %122 : f32 to vector<8x10xf32>
    %124 = arith.mulf %9, %123 : vector<8x10xf32>
    %125 = arith.addf %121, %124 : vector<8x10xf32>
    %c5_69 = arith.constant 5 : index
    %c3_70 = arith.constant 3 : index
    %126 = memref.load %arg2[%c5_69, %c3_70] : memref<7x7xf32, #tpu.memory_space<smem>>
    %127 = vector.broadcast %126 : f32 to vector<8x10xf32>
    %128 = arith.mulf %11, %127 : vector<8x10xf32>
    %129 = arith.addf %125, %128 : vector<8x10xf32>
    %c6_71 = arith.constant 6 : index
    %c3_72 = arith.constant 3 : index
    %130 = memref.load %arg2[%c6_71, %c3_72] : memref<7x7xf32, #tpu.memory_space<smem>>
    %131 = vector.broadcast %130 : f32 to vector<8x10xf32>
    %132 = arith.mulf %13, %131 : vector<8x10xf32>
    %133 = arith.addf %129, %132 : vector<8x10xf32>
    %c3_73 = arith.constant 3 : index
    %134 = memref.load %arg3[%c3_73] : memref<7xf32, #tpu.memory_space<smem>>
    %135 = vector.broadcast %134 : f32 to vector<8x10xf32>
    %136 = arith.addf %133, %135 : vector<8x10xf32>
    %137 = math.tanh %136 : vector<8x10xf32>
    %c0_74 = arith.constant 0 : index
    %c4_75 = arith.constant 4 : index
    %138 = memref.load %arg2[%c0_74, %c4_75] : memref<7x7xf32, #tpu.memory_space<smem>>
    %139 = vector.broadcast %138 : f32 to vector<8x10xf32>
    %140 = arith.mulf %1, %139 : vector<8x10xf32>
    %c1_76 = arith.constant 1 : index
    %c4_77 = arith.constant 4 : index
    %141 = memref.load %arg2[%c1_76, %c4_77] : memref<7x7xf32, #tpu.memory_space<smem>>
    %142 = vector.broadcast %141 : f32 to vector<8x10xf32>
    %143 = arith.mulf %3, %142 : vector<8x10xf32>
    %144 = arith.addf %140, %143 : vector<8x10xf32>
    %c2_78 = arith.constant 2 : index
    %c4_79 = arith.constant 4 : index
    %145 = memref.load %arg2[%c2_78, %c4_79] : memref<7x7xf32, #tpu.memory_space<smem>>
    %146 = vector.broadcast %145 : f32 to vector<8x10xf32>
    %147 = arith.mulf %5, %146 : vector<8x10xf32>
    %148 = arith.addf %144, %147 : vector<8x10xf32>
    %c3_80 = arith.constant 3 : index
    %c4_81 = arith.constant 4 : index
    %149 = memref.load %arg2[%c3_80, %c4_81] : memref<7x7xf32, #tpu.memory_space<smem>>
    %150 = vector.broadcast %149 : f32 to vector<8x10xf32>
    %151 = arith.mulf %7, %150 : vector<8x10xf32>
    %152 = arith.addf %148, %151 : vector<8x10xf32>
    %c4_82 = arith.constant 4 : index
    %c4_83 = arith.constant 4 : index
    %153 = memref.load %arg2[%c4_82, %c4_83] : memref<7x7xf32, #tpu.memory_space<smem>>
    %154 = vector.broadcast %153 : f32 to vector<8x10xf32>
    %155 = arith.mulf %9, %154 : vector<8x10xf32>
    %156 = arith.addf %152, %155 : vector<8x10xf32>
    %c5_84 = arith.constant 5 : index
    %c4_85 = arith.constant 4 : index
    %157 = memref.load %arg2[%c5_84, %c4_85] : memref<7x7xf32, #tpu.memory_space<smem>>
    %158 = vector.broadcast %157 : f32 to vector<8x10xf32>
    %159 = arith.mulf %11, %158 : vector<8x10xf32>
    %160 = arith.addf %156, %159 : vector<8x10xf32>
    %c6_86 = arith.constant 6 : index
    %c4_87 = arith.constant 4 : index
    %161 = memref.load %arg2[%c6_86, %c4_87] : memref<7x7xf32, #tpu.memory_space<smem>>
    %162 = vector.broadcast %161 : f32 to vector<8x10xf32>
    %163 = arith.mulf %13, %162 : vector<8x10xf32>
    %164 = arith.addf %160, %163 : vector<8x10xf32>
    %c4_88 = arith.constant 4 : index
    %165 = memref.load %arg3[%c4_88] : memref<7xf32, #tpu.memory_space<smem>>
    %166 = vector.broadcast %165 : f32 to vector<8x10xf32>
    %167 = arith.addf %164, %166 : vector<8x10xf32>
    %168 = math.tanh %167 : vector<8x10xf32>
    %c0_89 = arith.constant 0 : index
    %c5_90 = arith.constant 5 : index
    %169 = memref.load %arg2[%c0_89, %c5_90] : memref<7x7xf32, #tpu.memory_space<smem>>
    %170 = vector.broadcast %169 : f32 to vector<8x10xf32>
    %171 = arith.mulf %1, %170 : vector<8x10xf32>
    %c1_91 = arith.constant 1 : index
    %c5_92 = arith.constant 5 : index
    %172 = memref.load %arg2[%c1_91, %c5_92] : memref<7x7xf32, #tpu.memory_space<smem>>
    %173 = vector.broadcast %172 : f32 to vector<8x10xf32>
    %174 = arith.mulf %3, %173 : vector<8x10xf32>
    %175 = arith.addf %171, %174 : vector<8x10xf32>
    %c2_93 = arith.constant 2 : index
    %c5_94 = arith.constant 5 : index
    %176 = memref.load %arg2[%c2_93, %c5_94] : memref<7x7xf32, #tpu.memory_space<smem>>
    %177 = vector.broadcast %176 : f32 to vector<8x10xf32>
    %178 = arith.mulf %5, %177 : vector<8x10xf32>
    %179 = arith.addf %175, %178 : vector<8x10xf32>
    %c3_95 = arith.constant 3 : index
    %c5_96 = arith.constant 5 : index
    %180 = memref.load %arg2[%c3_95, %c5_96] : memref<7x7xf32, #tpu.memory_space<smem>>
    %181 = vector.broadcast %180 : f32 to vector<8x10xf32>
    %182 = arith.mulf %7, %181 : vector<8x10xf32>
    %183 = arith.addf %179, %182 : vector<8x10xf32>
    %c4_97 = arith.constant 4 : index
    %c5_98 = arith.constant 5 : index
    %184 = memref.load %arg2[%c4_97, %c5_98] : memref<7x7xf32, #tpu.memory_space<smem>>
    %185 = vector.broadcast %184 : f32 to vector<8x10xf32>
    %186 = arith.mulf %9, %185 : vector<8x10xf32>
    %187 = arith.addf %183, %186 : vector<8x10xf32>
    %c5_99 = arith.constant 5 : index
    %c5_100 = arith.constant 5 : index
    %188 = memref.load %arg2[%c5_99, %c5_100] : memref<7x7xf32, #tpu.memory_space<smem>>
    %189 = vector.broadcast %188 : f32 to vector<8x10xf32>
    %190 = arith.mulf %11, %189 : vector<8x10xf32>
    %191 = arith.addf %187, %190 : vector<8x10xf32>
    %c6_101 = arith.constant 6 : index
    %c5_102 = arith.constant 5 : index
    %192 = memref.load %arg2[%c6_101, %c5_102] : memref<7x7xf32, #tpu.memory_space<smem>>
    %193 = vector.broadcast %192 : f32 to vector<8x10xf32>
    %194 = arith.mulf %13, %193 : vector<8x10xf32>
    %195 = arith.addf %191, %194 : vector<8x10xf32>
    %c5_103 = arith.constant 5 : index
    %196 = memref.load %arg3[%c5_103] : memref<7xf32, #tpu.memory_space<smem>>
    %197 = vector.broadcast %196 : f32 to vector<8x10xf32>
    %198 = arith.addf %195, %197 : vector<8x10xf32>
    %199 = math.tanh %198 : vector<8x10xf32>
    %c0_104 = arith.constant 0 : index
    %c6_105 = arith.constant 6 : index
    %200 = memref.load %arg2[%c0_104, %c6_105] : memref<7x7xf32, #tpu.memory_space<smem>>
    %201 = vector.broadcast %200 : f32 to vector<8x10xf32>
    %202 = arith.mulf %1, %201 : vector<8x10xf32>
    %c1_106 = arith.constant 1 : index
    %c6_107 = arith.constant 6 : index
    %203 = memref.load %arg2[%c1_106, %c6_107] : memref<7x7xf32, #tpu.memory_space<smem>>
    %204 = vector.broadcast %203 : f32 to vector<8x10xf32>
    %205 = arith.mulf %3, %204 : vector<8x10xf32>
    %206 = arith.addf %202, %205 : vector<8x10xf32>
    %c2_108 = arith.constant 2 : index
    %c6_109 = arith.constant 6 : index
    %207 = memref.load %arg2[%c2_108, %c6_109] : memref<7x7xf32, #tpu.memory_space<smem>>
    %208 = vector.broadcast %207 : f32 to vector<8x10xf32>
    %209 = arith.mulf %5, %208 : vector<8x10xf32>
    %210 = arith.addf %206, %209 : vector<8x10xf32>
    %c3_110 = arith.constant 3 : index
    %c6_111 = arith.constant 6 : index
    %211 = memref.load %arg2[%c3_110, %c6_111] : memref<7x7xf32, #tpu.memory_space<smem>>
    %212 = vector.broadcast %211 : f32 to vector<8x10xf32>
    %213 = arith.mulf %7, %212 : vector<8x10xf32>
    %214 = arith.addf %210, %213 : vector<8x10xf32>
    %c4_112 = arith.constant 4 : index
    %c6_113 = arith.constant 6 : index
    %215 = memref.load %arg2[%c4_112, %c6_113] : memref<7x7xf32, #tpu.memory_space<smem>>
    %216 = vector.broadcast %215 : f32 to vector<8x10xf32>
    %217 = arith.mulf %9, %216 : vector<8x10xf32>
    %218 = arith.addf %214, %217 : vector<8x10xf32>
    %c5_114 = arith.constant 5 : index
    %c6_115 = arith.constant 6 : index
    %219 = memref.load %arg2[%c5_114, %c6_115] : memref<7x7xf32, #tpu.memory_space<smem>>
    %220 = vector.broadcast %219 : f32 to vector<8x10xf32>
    %221 = arith.mulf %11, %220 : vector<8x10xf32>
    %222 = arith.addf %218, %221 : vector<8x10xf32>
    %c6_116 = arith.constant 6 : index
    %c6_117 = arith.constant 6 : index
    %223 = memref.load %arg2[%c6_116, %c6_117] : memref<7x7xf32, #tpu.memory_space<smem>>
    %224 = vector.broadcast %223 : f32 to vector<8x10xf32>
    %225 = arith.mulf %13, %224 : vector<8x10xf32>
    %226 = arith.addf %222, %225 : vector<8x10xf32>
    %c6_118 = arith.constant 6 : index
    %227 = memref.load %arg3[%c6_118] : memref<7xf32, #tpu.memory_space<smem>>
    %228 = vector.broadcast %227 : f32 to vector<8x10xf32>
    %229 = arith.addf %226, %228 : vector<8x10xf32>
    %230 = math.tanh %229 : vector<8x10xf32>
    %c0_119 = arith.constant 0 : index
    %c0_120 = arith.constant 0 : index
    %231 = memref.load %arg4[%c0_119, %c0_120] : memref<7x7xf32, #tpu.memory_space<smem>>
    %232 = vector.broadcast %231 : f32 to vector<8x10xf32>
    %233 = arith.mulf %44, %232 : vector<8x10xf32>
    %c1_121 = arith.constant 1 : index
    %c0_122 = arith.constant 0 : index
    %234 = memref.load %arg4[%c1_121, %c0_122] : memref<7x7xf32, #tpu.memory_space<smem>>
    %235 = vector.broadcast %234 : f32 to vector<8x10xf32>
    %236 = arith.mulf %75, %235 : vector<8x10xf32>
    %237 = arith.addf %233, %236 : vector<8x10xf32>
    %c2_123 = arith.constant 2 : index
    %c0_124 = arith.constant 0 : index
    %238 = memref.load %arg4[%c2_123, %c0_124] : memref<7x7xf32, #tpu.memory_space<smem>>
    %239 = vector.broadcast %238 : f32 to vector<8x10xf32>
    %240 = arith.mulf %106, %239 : vector<8x10xf32>
    %241 = arith.addf %237, %240 : vector<8x10xf32>
    %c3_125 = arith.constant 3 : index
    %c0_126 = arith.constant 0 : index
    %242 = memref.load %arg4[%c3_125, %c0_126] : memref<7x7xf32, #tpu.memory_space<smem>>
    %243 = vector.broadcast %242 : f32 to vector<8x10xf32>
    %244 = arith.mulf %137, %243 : vector<8x10xf32>
    %245 = arith.addf %241, %244 : vector<8x10xf32>
    %c4_127 = arith.constant 4 : index
    %c0_128 = arith.constant 0 : index
    %246 = memref.load %arg4[%c4_127, %c0_128] : memref<7x7xf32, #tpu.memory_space<smem>>
    %247 = vector.broadcast %246 : f32 to vector<8x10xf32>
    %248 = arith.mulf %168, %247 : vector<8x10xf32>
    %249 = arith.addf %245, %248 : vector<8x10xf32>
    %c5_129 = arith.constant 5 : index
    %c0_130 = arith.constant 0 : index
    %250 = memref.load %arg4[%c5_129, %c0_130] : memref<7x7xf32, #tpu.memory_space<smem>>
    %251 = vector.broadcast %250 : f32 to vector<8x10xf32>
    %252 = arith.mulf %199, %251 : vector<8x10xf32>
    %253 = arith.addf %249, %252 : vector<8x10xf32>
    %c6_131 = arith.constant 6 : index
    %c0_132 = arith.constant 0 : index
    %254 = memref.load %arg4[%c6_131, %c0_132] : memref<7x7xf32, #tpu.memory_space<smem>>
    %255 = vector.broadcast %254 : f32 to vector<8x10xf32>
    %256 = arith.mulf %230, %255 : vector<8x10xf32>
    %257 = arith.addf %253, %256 : vector<8x10xf32>
    %c0_133 = arith.constant 0 : index
    %258 = memref.load %arg5[%c0_133] : memref<7xf32, #tpu.memory_space<smem>>
    %259 = vector.broadcast %258 : f32 to vector<8x10xf32>
    %260 = arith.addf %257, %259 : vector<8x10xf32>
    %c0_134 = arith.constant 0 : index
    %c1_135 = arith.constant 1 : index
    %261 = memref.load %arg4[%c0_134, %c1_135] : memref<7x7xf32, #tpu.memory_space<smem>>
    %262 = vector.broadcast %261 : f32 to vector<8x10xf32>
    %263 = arith.mulf %44, %262 : vector<8x10xf32>
    %c1_136 = arith.constant 1 : index
    %c1_137 = arith.constant 1 : index
    %264 = memref.load %arg4[%c1_136, %c1_137] : memref<7x7xf32, #tpu.memory_space<smem>>
    %265 = vector.broadcast %264 : f32 to vector<8x10xf32>
    %266 = arith.mulf %75, %265 : vector<8x10xf32>
    %267 = arith.addf %263, %266 : vector<8x10xf32>
    %c2_138 = arith.constant 2 : index
    %c1_139 = arith.constant 1 : index
    %268 = memref.load %arg4[%c2_138, %c1_139] : memref<7x7xf32, #tpu.memory_space<smem>>
    %269 = vector.broadcast %268 : f32 to vector<8x10xf32>
    %270 = arith.mulf %106, %269 : vector<8x10xf32>
    %271 = arith.addf %267, %270 : vector<8x10xf32>
    %c3_140 = arith.constant 3 : index
    %c1_141 = arith.constant 1 : index
    %272 = memref.load %arg4[%c3_140, %c1_141] : memref<7x7xf32, #tpu.memory_space<smem>>
    %273 = vector.broadcast %272 : f32 to vector<8x10xf32>
    %274 = arith.mulf %137, %273 : vector<8x10xf32>
    %275 = arith.addf %271, %274 : vector<8x10xf32>
    %c4_142 = arith.constant 4 : index
    %c1_143 = arith.constant 1 : index
    %276 = memref.load %arg4[%c4_142, %c1_143] : memref<7x7xf32, #tpu.memory_space<smem>>
    %277 = vector.broadcast %276 : f32 to vector<8x10xf32>
    %278 = arith.mulf %168, %277 : vector<8x10xf32>
    %279 = arith.addf %275, %278 : vector<8x10xf32>
    %c5_144 = arith.constant 5 : index
    %c1_145 = arith.constant 1 : index
    %280 = memref.load %arg4[%c5_144, %c1_145] : memref<7x7xf32, #tpu.memory_space<smem>>
    %281 = vector.broadcast %280 : f32 to vector<8x10xf32>
    %282 = arith.mulf %199, %281 : vector<8x10xf32>
    %283 = arith.addf %279, %282 : vector<8x10xf32>
    %c6_146 = arith.constant 6 : index
    %c1_147 = arith.constant 1 : index
    %284 = memref.load %arg4[%c6_146, %c1_147] : memref<7x7xf32, #tpu.memory_space<smem>>
    %285 = vector.broadcast %284 : f32 to vector<8x10xf32>
    %286 = arith.mulf %230, %285 : vector<8x10xf32>
    %287 = arith.addf %283, %286 : vector<8x10xf32>
    %c1_148 = arith.constant 1 : index
    %288 = memref.load %arg5[%c1_148] : memref<7xf32, #tpu.memory_space<smem>>
    %289 = vector.broadcast %288 : f32 to vector<8x10xf32>
    %290 = arith.addf %287, %289 : vector<8x10xf32>
    %c0_149 = arith.constant 0 : index
    %c2_150 = arith.constant 2 : index
    %291 = memref.load %arg4[%c0_149, %c2_150] : memref<7x7xf32, #tpu.memory_space<smem>>
    %292 = vector.broadcast %291 : f32 to vector<8x10xf32>
    %293 = arith.mulf %44, %292 : vector<8x10xf32>
    %c1_151 = arith.constant 1 : index
    %c2_152 = arith.constant 2 : index
    %294 = memref.load %arg4[%c1_151, %c2_152] : memref<7x7xf32, #tpu.memory_space<smem>>
    %295 = vector.broadcast %294 : f32 to vector<8x10xf32>
    %296 = arith.mulf %75, %295 : vector<8x10xf32>
    %297 = arith.addf %293, %296 : vector<8x10xf32>
    %c2_153 = arith.constant 2 : index
    %c2_154 = arith.constant 2 : index
    %298 = memref.load %arg4[%c2_153, %c2_154] : memref<7x7xf32, #tpu.memory_space<smem>>
    %299 = vector.broadcast %298 : f32 to vector<8x10xf32>
    %300 = arith.mulf %106, %299 : vector<8x10xf32>
    %301 = arith.addf %297, %300 : vector<8x10xf32>
    %c3_155 = arith.constant 3 : index
    %c2_156 = arith.constant 2 : index
    %302 = memref.load %arg4[%c3_155, %c2_156] : memref<7x7xf32, #tpu.memory_space<smem>>
    %303 = vector.broadcast %302 : f32 to vector<8x10xf32>
    %304 = arith.mulf %137, %303 : vector<8x10xf32>
    %305 = arith.addf %301, %304 : vector<8x10xf32>
    %c4_157 = arith.constant 4 : index
    %c2_158 = arith.constant 2 : index
    %306 = memref.load %arg4[%c4_157, %c2_158] : memref<7x7xf32, #tpu.memory_space<smem>>
    %307 = vector.broadcast %306 : f32 to vector<8x10xf32>
    %308 = arith.mulf %168, %307 : vector<8x10xf32>
    %309 = arith.addf %305, %308 : vector<8x10xf32>
    %c5_159 = arith.constant 5 : index
    %c2_160 = arith.constant 2 : index
    %310 = memref.load %arg4[%c5_159, %c2_160] : memref<7x7xf32, #tpu.memory_space<smem>>
    %311 = vector.broadcast %310 : f32 to vector<8x10xf32>
    %312 = arith.mulf %199, %311 : vector<8x10xf32>
    %313 = arith.addf %309, %312 : vector<8x10xf32>
    %c6_161 = arith.constant 6 : index
    %c2_162 = arith.constant 2 : index
    %314 = memref.load %arg4[%c6_161, %c2_162] : memref<7x7xf32, #tpu.memory_space<smem>>
    %315 = vector.broadcast %314 : f32 to vector<8x10xf32>
    %316 = arith.mulf %230, %315 : vector<8x10xf32>
    %317 = arith.addf %313, %316 : vector<8x10xf32>
    %c2_163 = arith.constant 2 : index
    %318 = memref.load %arg5[%c2_163] : memref<7xf32, #tpu.memory_space<smem>>
    %319 = vector.broadcast %318 : f32 to vector<8x10xf32>
    %320 = arith.addf %317, %319 : vector<8x10xf32>
    %c0_164 = arith.constant 0 : index
    %c3_165 = arith.constant 3 : index
    %321 = memref.load %arg4[%c0_164, %c3_165] : memref<7x7xf32, #tpu.memory_space<smem>>
    %322 = vector.broadcast %321 : f32 to vector<8x10xf32>
    %323 = arith.mulf %44, %322 : vector<8x10xf32>
    %c1_166 = arith.constant 1 : index
    %c3_167 = arith.constant 3 : index
    %324 = memref.load %arg4[%c1_166, %c3_167] : memref<7x7xf32, #tpu.memory_space<smem>>
    %325 = vector.broadcast %324 : f32 to vector<8x10xf32>
    %326 = arith.mulf %75, %325 : vector<8x10xf32>
    %327 = arith.addf %323, %326 : vector<8x10xf32>
    %c2_168 = arith.constant 2 : index
    %c3_169 = arith.constant 3 : index
    %328 = memref.load %arg4[%c2_168, %c3_169] : memref<7x7xf32, #tpu.memory_space<smem>>
    %329 = vector.broadcast %328 : f32 to vector<8x10xf32>
    %330 = arith.mulf %106, %329 : vector<8x10xf32>
    %331 = arith.addf %327, %330 : vector<8x10xf32>
    %c3_170 = arith.constant 3 : index
    %c3_171 = arith.constant 3 : index
    %332 = memref.load %arg4[%c3_170, %c3_171] : memref<7x7xf32, #tpu.memory_space<smem>>
    %333 = vector.broadcast %332 : f32 to vector<8x10xf32>
    %334 = arith.mulf %137, %333 : vector<8x10xf32>
    %335 = arith.addf %331, %334 : vector<8x10xf32>
    %c4_172 = arith.constant 4 : index
    %c3_173 = arith.constant 3 : index
    %336 = memref.load %arg4[%c4_172, %c3_173] : memref<7x7xf32, #tpu.memory_space<smem>>
    %337 = vector.broadcast %336 : f32 to vector<8x10xf32>
    %338 = arith.mulf %168, %337 : vector<8x10xf32>
    %339 = arith.addf %335, %338 : vector<8x10xf32>
    %c5_174 = arith.constant 5 : index
    %c3_175 = arith.constant 3 : index
    %340 = memref.load %arg4[%c5_174, %c3_175] : memref<7x7xf32, #tpu.memory_space<smem>>
    %341 = vector.broadcast %340 : f32 to vector<8x10xf32>
    %342 = arith.mulf %199, %341 : vector<8x10xf32>
    %343 = arith.addf %339, %342 : vector<8x10xf32>
    %c6_176 = arith.constant 6 : index
    %c3_177 = arith.constant 3 : index
    %344 = memref.load %arg4[%c6_176, %c3_177] : memref<7x7xf32, #tpu.memory_space<smem>>
    %345 = vector.broadcast %344 : f32 to vector<8x10xf32>
    %346 = arith.mulf %230, %345 : vector<8x10xf32>
    %347 = arith.addf %343, %346 : vector<8x10xf32>
    %c3_178 = arith.constant 3 : index
    %348 = memref.load %arg5[%c3_178] : memref<7xf32, #tpu.memory_space<smem>>
    %349 = vector.broadcast %348 : f32 to vector<8x10xf32>
    %350 = arith.addf %347, %349 : vector<8x10xf32>
    %c0_179 = arith.constant 0 : index
    %c4_180 = arith.constant 4 : index
    %351 = memref.load %arg4[%c0_179, %c4_180] : memref<7x7xf32, #tpu.memory_space<smem>>
    %352 = vector.broadcast %351 : f32 to vector<8x10xf32>
    %353 = arith.mulf %44, %352 : vector<8x10xf32>
    %c1_181 = arith.constant 1 : index
    %c4_182 = arith.constant 4 : index
    %354 = memref.load %arg4[%c1_181, %c4_182] : memref<7x7xf32, #tpu.memory_space<smem>>
    %355 = vector.broadcast %354 : f32 to vector<8x10xf32>
    %356 = arith.mulf %75, %355 : vector<8x10xf32>
    %357 = arith.addf %353, %356 : vector<8x10xf32>
    %c2_183 = arith.constant 2 : index
    %c4_184 = arith.constant 4 : index
    %358 = memref.load %arg4[%c2_183, %c4_184] : memref<7x7xf32, #tpu.memory_space<smem>>
    %359 = vector.broadcast %358 : f32 to vector<8x10xf32>
    %360 = arith.mulf %106, %359 : vector<8x10xf32>
    %361 = arith.addf %357, %360 : vector<8x10xf32>
    %c3_185 = arith.constant 3 : index
    %c4_186 = arith.constant 4 : index
    %362 = memref.load %arg4[%c3_185, %c4_186] : memref<7x7xf32, #tpu.memory_space<smem>>
    %363 = vector.broadcast %362 : f32 to vector<8x10xf32>
    %364 = arith.mulf %137, %363 : vector<8x10xf32>
    %365 = arith.addf %361, %364 : vector<8x10xf32>
    %c4_187 = arith.constant 4 : index
    %c4_188 = arith.constant 4 : index
    %366 = memref.load %arg4[%c4_187, %c4_188] : memref<7x7xf32, #tpu.memory_space<smem>>
    %367 = vector.broadcast %366 : f32 to vector<8x10xf32>
    %368 = arith.mulf %168, %367 : vector<8x10xf32>
    %369 = arith.addf %365, %368 : vector<8x10xf32>
    %c5_189 = arith.constant 5 : index
    %c4_190 = arith.constant 4 : index
    %370 = memref.load %arg4[%c5_189, %c4_190] : memref<7x7xf32, #tpu.memory_space<smem>>
    %371 = vector.broadcast %370 : f32 to vector<8x10xf32>
    %372 = arith.mulf %199, %371 : vector<8x10xf32>
    %373 = arith.addf %369, %372 : vector<8x10xf32>
    %c6_191 = arith.constant 6 : index
    %c4_192 = arith.constant 4 : index
    %374 = memref.load %arg4[%c6_191, %c4_192] : memref<7x7xf32, #tpu.memory_space<smem>>
    %375 = vector.broadcast %374 : f32 to vector<8x10xf32>
    %376 = arith.mulf %230, %375 : vector<8x10xf32>
    %377 = arith.addf %373, %376 : vector<8x10xf32>
    %c4_193 = arith.constant 4 : index
    %378 = memref.load %arg5[%c4_193] : memref<7xf32, #tpu.memory_space<smem>>
    %379 = vector.broadcast %378 : f32 to vector<8x10xf32>
    %380 = arith.addf %377, %379 : vector<8x10xf32>
    %c0_194 = arith.constant 0 : index
    %c5_195 = arith.constant 5 : index
    %381 = memref.load %arg4[%c0_194, %c5_195] : memref<7x7xf32, #tpu.memory_space<smem>>
    %382 = vector.broadcast %381 : f32 to vector<8x10xf32>
    %383 = arith.mulf %44, %382 : vector<8x10xf32>
    %c1_196 = arith.constant 1 : index
    %c5_197 = arith.constant 5 : index
    %384 = memref.load %arg4[%c1_196, %c5_197] : memref<7x7xf32, #tpu.memory_space<smem>>
    %385 = vector.broadcast %384 : f32 to vector<8x10xf32>
    %386 = arith.mulf %75, %385 : vector<8x10xf32>
    %387 = arith.addf %383, %386 : vector<8x10xf32>
    %c2_198 = arith.constant 2 : index
    %c5_199 = arith.constant 5 : index
    %388 = memref.load %arg4[%c2_198, %c5_199] : memref<7x7xf32, #tpu.memory_space<smem>>
    %389 = vector.broadcast %388 : f32 to vector<8x10xf32>
    %390 = arith.mulf %106, %389 : vector<8x10xf32>
    %391 = arith.addf %387, %390 : vector<8x10xf32>
    %c3_200 = arith.constant 3 : index
    %c5_201 = arith.constant 5 : index
    %392 = memref.load %arg4[%c3_200, %c5_201] : memref<7x7xf32, #tpu.memory_space<smem>>
    %393 = vector.broadcast %392 : f32 to vector<8x10xf32>
    %394 = arith.mulf %137, %393 : vector<8x10xf32>
    %395 = arith.addf %391, %394 : vector<8x10xf32>
    %c4_202 = arith.constant 4 : index
    %c5_203 = arith.constant 5 : index
    %396 = memref.load %arg4[%c4_202, %c5_203] : memref<7x7xf32, #tpu.memory_space<smem>>
    %397 = vector.broadcast %396 : f32 to vector<8x10xf32>
    %398 = arith.mulf %168, %397 : vector<8x10xf32>
    %399 = arith.addf %395, %398 : vector<8x10xf32>
    %c5_204 = arith.constant 5 : index
    %c5_205 = arith.constant 5 : index
    %400 = memref.load %arg4[%c5_204, %c5_205] : memref<7x7xf32, #tpu.memory_space<smem>>
    %401 = vector.broadcast %400 : f32 to vector<8x10xf32>
    %402 = arith.mulf %199, %401 : vector<8x10xf32>
    %403 = arith.addf %399, %402 : vector<8x10xf32>
    %c6_206 = arith.constant 6 : index
    %c5_207 = arith.constant 5 : index
    %404 = memref.load %arg4[%c6_206, %c5_207] : memref<7x7xf32, #tpu.memory_space<smem>>
    %405 = vector.broadcast %404 : f32 to vector<8x10xf32>
    %406 = arith.mulf %230, %405 : vector<8x10xf32>
    %407 = arith.addf %403, %406 : vector<8x10xf32>
    %c5_208 = arith.constant 5 : index
    %408 = memref.load %arg5[%c5_208] : memref<7xf32, #tpu.memory_space<smem>>
    %409 = vector.broadcast %408 : f32 to vector<8x10xf32>
    %410 = arith.addf %407, %409 : vector<8x10xf32>
    %c0_209 = arith.constant 0 : index
    %c6_210 = arith.constant 6 : index
    %411 = memref.load %arg4[%c0_209, %c6_210] : memref<7x7xf32, #tpu.memory_space<smem>>
    %412 = vector.broadcast %411 : f32 to vector<8x10xf32>
    %413 = arith.mulf %44, %412 : vector<8x10xf32>
    %c1_211 = arith.constant 1 : index
    %c6_212 = arith.constant 6 : index
    %414 = memref.load %arg4[%c1_211, %c6_212] : memref<7x7xf32, #tpu.memory_space<smem>>
    %415 = vector.broadcast %414 : f32 to vector<8x10xf32>
    %416 = arith.mulf %75, %415 : vector<8x10xf32>
    %417 = arith.addf %413, %416 : vector<8x10xf32>
    %c2_213 = arith.constant 2 : index
    %c6_214 = arith.constant 6 : index
    %418 = memref.load %arg4[%c2_213, %c6_214] : memref<7x7xf32, #tpu.memory_space<smem>>
    %419 = vector.broadcast %418 : f32 to vector<8x10xf32>
    %420 = arith.mulf %106, %419 : vector<8x10xf32>
    %421 = arith.addf %417, %420 : vector<8x10xf32>
    %c3_215 = arith.constant 3 : index
    %c6_216 = arith.constant 6 : index
    %422 = memref.load %arg4[%c3_215, %c6_216] : memref<7x7xf32, #tpu.memory_space<smem>>
    %423 = vector.broadcast %422 : f32 to vector<8x10xf32>
    %424 = arith.mulf %137, %423 : vector<8x10xf32>
    %425 = arith.addf %421, %424 : vector<8x10xf32>
    %c4_217 = arith.constant 4 : index
    %c6_218 = arith.constant 6 : index
    %426 = memref.load %arg4[%c4_217, %c6_218] : memref<7x7xf32, #tpu.memory_space<smem>>
    %427 = vector.broadcast %426 : f32 to vector<8x10xf32>
    %428 = arith.mulf %168, %427 : vector<8x10xf32>
    %429 = arith.addf %425, %428 : vector<8x10xf32>
    %c5_219 = arith.constant 5 : index
    %c6_220 = arith.constant 6 : index
    %430 = memref.load %arg4[%c5_219, %c6_220] : memref<7x7xf32, #tpu.memory_space<smem>>
    %431 = vector.broadcast %430 : f32 to vector<8x10xf32>
    %432 = arith.mulf %199, %431 : vector<8x10xf32>
    %433 = arith.addf %429, %432 : vector<8x10xf32>
    %c6_221 = arith.constant 6 : index
    %c6_222 = arith.constant 6 : index
    %434 = memref.load %arg4[%c6_221, %c6_222] : memref<7x7xf32, #tpu.memory_space<smem>>
    %435 = vector.broadcast %434 : f32 to vector<8x10xf32>
    %436 = arith.mulf %230, %435 : vector<8x10xf32>
    %437 = arith.addf %433, %436 : vector<8x10xf32>
    %c6_223 = arith.constant 6 : index
    %438 = memref.load %arg5[%c6_223] : memref<7xf32, #tpu.memory_space<smem>>
    %439 = vector.broadcast %438 : f32 to vector<8x10xf32>
    %440 = arith.addf %437, %439 : vector<8x10xf32>
    %cst = arith.constant dense<0xFF800000> : vector<10xf32>
    %441 = vector.multi_reduction <maximumf>, %260, %cst [0] : vector<8x10xf32> to vector<10xf32>
    %442 = vector.shape_cast %441 : vector<10xf32> to vector<1x10xf32>
    %443 = vector.broadcast %442 : vector<1x10xf32> to vector<8x10xf32>
    %444 = arith.subf %260, %443 : vector<8x10xf32>
    %445 = math.exp %444 : vector<8x10xf32>
    %cst_224 = arith.constant dense<0.000000e+00> : vector<10xf32>
    %446 = vector.multi_reduction <add>, %445, %cst_224 [0] : vector<8x10xf32> to vector<10xf32>
    %447 = vector.shape_cast %446 : vector<10xf32> to vector<1x10xf32>
    %448 = tpu.reciprocal %447 {approx = true} : vector<1x10xf32> -> vector<1x10xf32>
    %449 = arith.mulf %447, %448 : vector<1x10xf32>
    %cst_225 = arith.constant 2.000000e+00 : f32
    %450 = vector.broadcast %cst_225 : f32 to vector<1x10xf32>
    %451 = arith.subf %450, %449 : vector<1x10xf32>
    %452 = arith.mulf %448, %451 : vector<1x10xf32>
    %453 = vector.broadcast %452 : vector<1x10xf32> to vector<8x10xf32>
    %454 = arith.mulf %445, %453 : vector<8x10xf32>
    %cst_226 = arith.constant dense<0xFF800000> : vector<10xf32>
    %455 = vector.multi_reduction <maximumf>, %290, %cst_226 [0] : vector<8x10xf32> to vector<10xf32>
    %456 = vector.shape_cast %455 : vector<10xf32> to vector<1x10xf32>
    %457 = vector.broadcast %456 : vector<1x10xf32> to vector<8x10xf32>
    %458 = arith.subf %290, %457 : vector<8x10xf32>
    %459 = math.exp %458 : vector<8x10xf32>
    %cst_227 = arith.constant dense<0.000000e+00> : vector<10xf32>
    %460 = vector.multi_reduction <add>, %459, %cst_227 [0] : vector<8x10xf32> to vector<10xf32>
    %461 = vector.shape_cast %460 : vector<10xf32> to vector<1x10xf32>
    %462 = tpu.reciprocal %461 {approx = true} : vector<1x10xf32> -> vector<1x10xf32>
    %463 = arith.mulf %461, %462 : vector<1x10xf32>
    %cst_228 = arith.constant 2.000000e+00 : f32
    %464 = vector.broadcast %cst_228 : f32 to vector<1x10xf32>
    %465 = arith.subf %464, %463 : vector<1x10xf32>
    %466 = arith.mulf %462, %465 : vector<1x10xf32>
    %467 = vector.broadcast %466 : vector<1x10xf32> to vector<8x10xf32>
    %468 = arith.mulf %459, %467 : vector<8x10xf32>
    %cst_229 = arith.constant dense<0xFF800000> : vector<10xf32>
    %469 = vector.multi_reduction <maximumf>, %320, %cst_229 [0] : vector<8x10xf32> to vector<10xf32>
    %470 = vector.shape_cast %469 : vector<10xf32> to vector<1x10xf32>
    %471 = vector.broadcast %470 : vector<1x10xf32> to vector<8x10xf32>
    %472 = arith.subf %320, %471 : vector<8x10xf32>
    %473 = math.exp %472 : vector<8x10xf32>
    %cst_230 = arith.constant dense<0.000000e+00> : vector<10xf32>
    %474 = vector.multi_reduction <add>, %473, %cst_230 [0] : vector<8x10xf32> to vector<10xf32>
    %475 = vector.shape_cast %474 : vector<10xf32> to vector<1x10xf32>
    %476 = tpu.reciprocal %475 {approx = true} : vector<1x10xf32> -> vector<1x10xf32>
    %477 = arith.mulf %475, %476 : vector<1x10xf32>
    %cst_231 = arith.constant 2.000000e+00 : f32
    %478 = vector.broadcast %cst_231 : f32 to vector<1x10xf32>
    %479 = arith.subf %478, %477 : vector<1x10xf32>
    %480 = arith.mulf %476, %479 : vector<1x10xf32>
    %481 = vector.broadcast %480 : vector<1x10xf32> to vector<8x10xf32>
    %482 = arith.mulf %473, %481 : vector<8x10xf32>
    %cst_232 = arith.constant dense<0xFF800000> : vector<10xf32>
    %483 = vector.multi_reduction <maximumf>, %350, %cst_232 [0] : vector<8x10xf32> to vector<10xf32>
    %484 = vector.shape_cast %483 : vector<10xf32> to vector<1x10xf32>
    %485 = vector.broadcast %484 : vector<1x10xf32> to vector<8x10xf32>
    %486 = arith.subf %350, %485 : vector<8x10xf32>
    %487 = math.exp %486 : vector<8x10xf32>
    %cst_233 = arith.constant dense<0.000000e+00> : vector<10xf32>
    %488 = vector.multi_reduction <add>, %487, %cst_233 [0] : vector<8x10xf32> to vector<10xf32>
    %489 = vector.shape_cast %488 : vector<10xf32> to vector<1x10xf32>
    %490 = tpu.reciprocal %489 {approx = true} : vector<1x10xf32> -> vector<1x10xf32>
    %491 = arith.mulf %489, %490 : vector<1x10xf32>
    %cst_234 = arith.constant 2.000000e+00 : f32
    %492 = vector.broadcast %cst_234 : f32 to vector<1x10xf32>
    %493 = arith.subf %492, %491 : vector<1x10xf32>
    %494 = arith.mulf %490, %493 : vector<1x10xf32>
    %495 = vector.broadcast %494 : vector<1x10xf32> to vector<8x10xf32>
    %496 = arith.mulf %487, %495 : vector<8x10xf32>
    %cst_235 = arith.constant dense<0xFF800000> : vector<10xf32>
    %497 = vector.multi_reduction <maximumf>, %380, %cst_235 [0] : vector<8x10xf32> to vector<10xf32>
    %498 = vector.shape_cast %497 : vector<10xf32> to vector<1x10xf32>
    %499 = vector.broadcast %498 : vector<1x10xf32> to vector<8x10xf32>
    %500 = arith.subf %380, %499 : vector<8x10xf32>
    %501 = math.exp %500 : vector<8x10xf32>
    %cst_236 = arith.constant dense<0.000000e+00> : vector<10xf32>
    %502 = vector.multi_reduction <add>, %501, %cst_236 [0] : vector<8x10xf32> to vector<10xf32>
    %503 = vector.shape_cast %502 : vector<10xf32> to vector<1x10xf32>
    %504 = tpu.reciprocal %503 {approx = true} : vector<1x10xf32> -> vector<1x10xf32>
    %505 = arith.mulf %503, %504 : vector<1x10xf32>
    %cst_237 = arith.constant 2.000000e+00 : f32
    %506 = vector.broadcast %cst_237 : f32 to vector<1x10xf32>
    %507 = arith.subf %506, %505 : vector<1x10xf32>
    %508 = arith.mulf %504, %507 : vector<1x10xf32>
    %509 = vector.broadcast %508 : vector<1x10xf32> to vector<8x10xf32>
    %510 = arith.mulf %501, %509 : vector<8x10xf32>
    %cst_238 = arith.constant dense<0xFF800000> : vector<10xf32>
    %511 = vector.multi_reduction <maximumf>, %410, %cst_238 [0] : vector<8x10xf32> to vector<10xf32>
    %512 = vector.shape_cast %511 : vector<10xf32> to vector<1x10xf32>
    %513 = vector.broadcast %512 : vector<1x10xf32> to vector<8x10xf32>
    %514 = arith.subf %410, %513 : vector<8x10xf32>
    %515 = math.exp %514 : vector<8x10xf32>
    %cst_239 = arith.constant dense<0.000000e+00> : vector<10xf32>
    %516 = vector.multi_reduction <add>, %515, %cst_239 [0] : vector<8x10xf32> to vector<10xf32>
    %517 = vector.shape_cast %516 : vector<10xf32> to vector<1x10xf32>
    %518 = tpu.reciprocal %517 {approx = true} : vector<1x10xf32> -> vector<1x10xf32>
    %519 = arith.mulf %517, %518 : vector<1x10xf32>
    %cst_240 = arith.constant 2.000000e+00 : f32
    %520 = vector.broadcast %cst_240 : f32 to vector<1x10xf32>
    %521 = arith.subf %520, %519 : vector<1x10xf32>
    %522 = arith.mulf %518, %521 : vector<1x10xf32>
    %523 = vector.broadcast %522 : vector<1x10xf32> to vector<8x10xf32>
    %524 = arith.mulf %515, %523 : vector<8x10xf32>
    %cst_241 = arith.constant dense<0xFF800000> : vector<10xf32>
    %525 = vector.multi_reduction <maximumf>, %440, %cst_241 [0] : vector<8x10xf32> to vector<10xf32>
    %526 = vector.shape_cast %525 : vector<10xf32> to vector<1x10xf32>
    %527 = vector.broadcast %526 : vector<1x10xf32> to vector<8x10xf32>
    %528 = arith.subf %440, %527 : vector<8x10xf32>
    %529 = math.exp %528 : vector<8x10xf32>
    %cst_242 = arith.constant dense<0.000000e+00> : vector<10xf32>
    %530 = vector.multi_reduction <add>, %529, %cst_242 [0] : vector<8x10xf32> to vector<10xf32>
    %531 = vector.shape_cast %530 : vector<10xf32> to vector<1x10xf32>
    %532 = tpu.reciprocal %531 {approx = true} : vector<1x10xf32> -> vector<1x10xf32>
    %533 = arith.mulf %531, %532 : vector<1x10xf32>
    %cst_243 = arith.constant 2.000000e+00 : f32
    %534 = vector.broadcast %cst_243 : f32 to vector<1x10xf32>
    %535 = arith.subf %534, %533 : vector<1x10xf32>
    %536 = arith.mulf %532, %535 : vector<1x10xf32>
    %537 = vector.broadcast %536 : vector<1x10xf32> to vector<8x10xf32>
    %538 = arith.mulf %529, %537 : vector<8x10xf32>
    %539 = arith.mulf %44, %454 : vector<8x10xf32>
    %540 = arith.mulf %75, %468 : vector<8x10xf32>
    %541 = arith.addf %539, %540 : vector<8x10xf32>
    %542 = arith.mulf %106, %482 : vector<8x10xf32>
    %543 = arith.addf %541, %542 : vector<8x10xf32>
    %544 = arith.mulf %137, %496 : vector<8x10xf32>
    %545 = arith.addf %543, %544 : vector<8x10xf32>
    %546 = arith.mulf %168, %510 : vector<8x10xf32>
    %547 = arith.addf %545, %546 : vector<8x10xf32>
    %548 = arith.mulf %199, %524 : vector<8x10xf32>
    %549 = arith.addf %547, %548 : vector<8x10xf32>
    %550 = arith.mulf %230, %538 : vector<8x10xf32>
    %551 = arith.addf %549, %550 : vector<8x10xf32>
    %552 = arith.mulf %1, %551 : vector<8x10xf32>
    %553 = arith.addf %1, %552 : vector<8x10xf32>
    %554 = arith.mulf %3, %551 : vector<8x10xf32>
    %555 = arith.addf %3, %554 : vector<8x10xf32>
    %556 = arith.mulf %5, %551 : vector<8x10xf32>
    %557 = arith.addf %5, %556 : vector<8x10xf32>
    %558 = arith.mulf %7, %551 : vector<8x10xf32>
    %559 = arith.addf %7, %558 : vector<8x10xf32>
    %560 = arith.mulf %9, %551 : vector<8x10xf32>
    %561 = arith.addf %9, %560 : vector<8x10xf32>
    %562 = arith.mulf %11, %551 : vector<8x10xf32>
    %563 = arith.addf %11, %562 : vector<8x10xf32>
    %564 = arith.mulf %13, %551 : vector<8x10xf32>
    %565 = arith.addf %13, %564 : vector<8x10xf32>
    %566 = arith.addf %553, %555 : vector<8x10xf32>
    %567 = arith.addf %566, %557 : vector<8x10xf32>
    %568 = arith.addf %567, %559 : vector<8x10xf32>
    %569 = arith.addf %568, %561 : vector<8x10xf32>
    %570 = arith.addf %569, %563 : vector<8x10xf32>
    %571 = arith.addf %570, %565 : vector<8x10xf32>
    %cst_244 = arith.constant 0.142857149 : f32
    %572 = vector.broadcast %cst_244 : f32 to vector<8x10xf32>
    %573 = arith.mulf %571, %572 : vector<8x10xf32>
    %574 = arith.subf %553, %573 : vector<8x10xf32>
    %575 = arith.mulf %574, %574 : vector<8x10xf32>
    %576 = arith.subf %555, %573 : vector<8x10xf32>
    %577 = arith.mulf %576, %576 : vector<8x10xf32>
    %578 = arith.addf %575, %577 : vector<8x10xf32>
    %579 = arith.subf %557, %573 : vector<8x10xf32>
    %580 = arith.mulf %579, %579 : vector<8x10xf32>
    %581 = arith.addf %578, %580 : vector<8x10xf32>
    %582 = arith.subf %559, %573 : vector<8x10xf32>
    %583 = arith.mulf %582, %582 : vector<8x10xf32>
    %584 = arith.addf %581, %583 : vector<8x10xf32>
    %585 = arith.subf %561, %573 : vector<8x10xf32>
    %586 = arith.mulf %585, %585 : vector<8x10xf32>
    %587 = arith.addf %584, %586 : vector<8x10xf32>
    %588 = arith.subf %563, %573 : vector<8x10xf32>
    %589 = arith.mulf %588, %588 : vector<8x10xf32>
    %590 = arith.addf %587, %589 : vector<8x10xf32>
    %591 = arith.subf %565, %573 : vector<8x10xf32>
    %592 = arith.mulf %591, %591 : vector<8x10xf32>
    %593 = arith.addf %590, %592 : vector<8x10xf32>
    %cst_245 = arith.constant 0.142857149 : f32
    %594 = vector.broadcast %cst_245 : f32 to vector<8x10xf32>
    %595 = arith.mulf %593, %594 : vector<8x10xf32>
    %cst_246 = arith.constant 9.99999974E-6 : f32
    %596 = vector.broadcast %cst_246 : f32 to vector<8x10xf32>
    %597 = arith.addf %595, %596 : vector<8x10xf32>
    %598 = math.rsqrt %597 : vector<8x10xf32>
    %599 = arith.subf %553, %573 : vector<8x10xf32>
    %600 = arith.mulf %599, %598 : vector<8x10xf32>
    %c0_247 = arith.constant 0 : index
    %601 = memref.load %arg6[%c0_247] : memref<7xf32, #tpu.memory_space<smem>>
    %602 = vector.broadcast %601 : f32 to vector<8x10xf32>
    %603 = arith.mulf %600, %602 : vector<8x10xf32>
    %c0_248 = arith.constant 0 : index
    %604 = memref.load %arg7[%c0_248] : memref<7xf32, #tpu.memory_space<smem>>
    %605 = vector.broadcast %604 : f32 to vector<8x10xf32>
    %606 = arith.addf %603, %605 : vector<8x10xf32>
    %c0_249 = arith.constant 0 : index
    %c0_250 = arith.constant 0 : index
    %c0_251 = arith.constant 0 : index
    %607 = vector.load %arg8[%c0_249, %c0_250, %c0_251] : memref<7x8x10xf32, #tpu.memory_space<vmem>>, vector<1x8x10xf32>
    %608 = vector.shape_cast %607 : vector<1x8x10xf32> to vector<8x10xf32>
    %609 = vector.shape_cast %606 : vector<8x10xf32> to vector<1x8x10xf32>
    tpu.vector_store %arg8[%c0_249, %c0_250, %c0_251], %609 {strides = array<i32>} : memref<7x8x10xf32, #tpu.memory_space<vmem>>, vector<1x8x10xf32>,
    %610 = arith.subf %555, %573 : vector<8x10xf32>
    %611 = arith.mulf %610, %598 : vector<8x10xf32>
    %c1_252 = arith.constant 1 : index
    %612 = memref.load %arg6[%c1_252] : memref<7xf32, #tpu.memory_space<smem>>
    %613 = vector.broadcast %612 : f32 to vector<8x10xf32>
    %614 = arith.mulf %611, %613 : vector<8x10xf32>
    %c1_253 = arith.constant 1 : index
    %615 = memref.load %arg7[%c1_253] : memref<7xf32, #tpu.memory_space<smem>>
    %616 = vector.broadcast %615 : f32 to vector<8x10xf32>
    %617 = arith.addf %614, %616 : vector<8x10xf32>
    %c1_254 = arith.constant 1 : index
    %c0_255 = arith.constant 0 : index
    %c0_256 = arith.constant 0 : index
    %618 = vector.load %arg8[%c1_254, %c0_255, %c0_256] : memref<7x8x10xf32, #tpu.memory_space<vmem>>, vector<1x8x10xf32>
    %619 = vector.shape_cast %618 : vector<1x8x10xf32> to vector<8x10xf32>
    %620 = vector.shape_cast %617 : vector<8x10xf32> to vector<1x8x10xf32>
    tpu.vector_store %arg8[%c1_254, %c0_255, %c0_256], %620 {strides = array<i32>} : memref<7x8x10xf32, #tpu.memory_space<vmem>>, vector<1x8x10xf32>,
    %621 = arith.subf %557, %573 : vector<8x10xf32>
    %622 = arith.mulf %621, %598 : vector<8x10xf32>
    %c2_257 = arith.constant 2 : index
    %623 = memref.load %arg6[%c2_257] : memref<7xf32, #tpu.memory_space<smem>>
    %624 = vector.broadcast %623 : f32 to vector<8x10xf32>
    %625 = arith.mulf %622, %624 : vector<8x10xf32>
    %c2_258 = arith.constant 2 : index
    %626 = memref.load %arg7[%c2_258] : memref<7xf32, #tpu.memory_space<smem>>
    %627 = vector.broadcast %626 : f32 to vector<8x10xf32>
    %628 = arith.addf %625, %627 : vector<8x10xf32>
    %c2_259 = arith.constant 2 : index
    %c0_260 = arith.constant 0 : index
    %c0_261 = arith.constant 0 : index
    %629 = vector.load %arg8[%c2_259, %c0_260, %c0_261] : memref<7x8x10xf32, #tpu.memory_space<vmem>>, vector<1x8x10xf32>
    %630 = vector.shape_cast %629 : vector<1x8x10xf32> to vector<8x10xf32>
    %631 = vector.shape_cast %628 : vector<8x10xf32> to vector<1x8x10xf32>
    tpu.vector_store %arg8[%c2_259, %c0_260, %c0_261], %631 {strides = array<i32>} : memref<7x8x10xf32, #tpu.memory_space<vmem>>, vector<1x8x10xf32>,
    %632 = arith.subf %559, %573 : vector<8x10xf32>
    %633 = arith.mulf %632, %598 : vector<8x10xf32>
    %c3_262 = arith.constant 3 : index
    %634 = memref.load %arg6[%c3_262] : memref<7xf32, #tpu.memory_space<smem>>
    %635 = vector.broadcast %634 : f32 to vector<8x10xf32>
    %636 = arith.mulf %633, %635 : vector<8x10xf32>
    %c3_263 = arith.constant 3 : index
    %637 = memref.load %arg7[%c3_263] : memref<7xf32, #tpu.memory_space<smem>>
    %638 = vector.broadcast %637 : f32 to vector<8x10xf32>
    %639 = arith.addf %636, %638 : vector<8x10xf32>
    %c3_264 = arith.constant 3 : index
    %c0_265 = arith.constant 0 : index
    %c0_266 = arith.constant 0 : index
    %640 = vector.load %arg8[%c3_264, %c0_265, %c0_266] : memref<7x8x10xf32, #tpu.memory_space<vmem>>, vector<1x8x10xf32>
    %641 = vector.shape_cast %640 : vector<1x8x10xf32> to vector<8x10xf32>
    %642 = vector.shape_cast %639 : vector<8x10xf32> to vector<1x8x10xf32>
    tpu.vector_store %arg8[%c3_264, %c0_265, %c0_266], %642 {strides = array<i32>} : memref<7x8x10xf32, #tpu.memory_space<vmem>>, vector<1x8x10xf32>,
    %643 = arith.subf %561, %573 : vector<8x10xf32>
    %644 = arith.mulf %643, %598 : vector<8x10xf32>
    %c4_267 = arith.constant 4 : index
    %645 = memref.load %arg6[%c4_267] : memref<7xf32, #tpu.memory_space<smem>>
    %646 = vector.broadcast %645 : f32 to vector<8x10xf32>
    %647 = arith.mulf %644, %646 : vector<8x10xf32>
    %c4_268 = arith.constant 4 : index
    %648 = memref.load %arg7[%c4_268] : memref<7xf32, #tpu.memory_space<smem>>
    %649 = vector.broadcast %648 : f32 to vector<8x10xf32>
    %650 = arith.addf %647, %649 : vector<8x10xf32>
    %c4_269 = arith.constant 4 : index
    %c0_270 = arith.constant 0 : index
    %c0_271 = arith.constant 0 : index
    %651 = vector.load %arg8[%c4_269, %c0_270, %c0_271] : memref<7x8x10xf32, #tpu.memory_space<vmem>>, vector<1x8x10xf32>
    %652 = vector.shape_cast %651 : vector<1x8x10xf32> to vector<8x10xf32>
    %653 = vector.shape_cast %650 : vector<8x10xf32> to vector<1x8x10xf32>
    tpu.vector_store %arg8[%c4_269, %c0_270, %c0_271], %653 {strides = array<i32>} : memref<7x8x10xf32, #tpu.memory_space<vmem>>, vector<1x8x10xf32>,
    %654 = arith.subf %563, %573 : vector<8x10xf32>
    %655 = arith.mulf %654, %598 : vector<8x10xf32>
    %c5_272 = arith.constant 5 : index
    %656 = memref.load %arg6[%c5_272] : memref<7xf32, #tpu.memory_space<smem>>
    %657 = vector.broadcast %656 : f32 to vector<8x10xf32>
    %658 = arith.mulf %655, %657 : vector<8x10xf32>
    %c5_273 = arith.constant 5 : index
    %659 = memref.load %arg7[%c5_273] : memref<7xf32, #tpu.memory_space<smem>>
    %660 = vector.broadcast %659 : f32 to vector<8x10xf32>
    %661 = arith.addf %658, %660 : vector<8x10xf32>
    %c5_274 = arith.constant 5 : index
    %c0_275 = arith.constant 0 : index
    %c0_276 = arith.constant 0 : index
    %662 = vector.load %arg8[%c5_274, %c0_275, %c0_276] : memref<7x8x10xf32, #tpu.memory_space<vmem>>, vector<1x8x10xf32>
    %663 = vector.shape_cast %662 : vector<1x8x10xf32> to vector<8x10xf32>
    %664 = vector.shape_cast %661 : vector<8x10xf32> to vector<1x8x10xf32>
    tpu.vector_store %arg8[%c5_274, %c0_275, %c0_276], %664 {strides = array<i32>} : memref<7x8x10xf32, #tpu.memory_space<vmem>>, vector<1x8x10xf32>,
    %665 = arith.subf %565, %573 : vector<8x10xf32>
    %666 = arith.mulf %665, %598 : vector<8x10xf32>
    %c6_277 = arith.constant 6 : index
    %667 = memref.load %arg6[%c6_277] : memref<7xf32, #tpu.memory_space<smem>>
    %668 = vector.broadcast %667 : f32 to vector<8x10xf32>
    %669 = arith.mulf %666, %668 : vector<8x10xf32>
    %c6_278 = arith.constant 6 : index
    %670 = memref.load %arg7[%c6_278] : memref<7xf32, #tpu.memory_space<smem>>
    %671 = vector.broadcast %670 : f32 to vector<8x10xf32>
    %672 = arith.addf %669, %671 : vector<8x10xf32>
    %c6_279 = arith.constant 6 : index
    %c0_280 = arith.constant 0 : index
    %c0_281 = arith.constant 0 : index
    %673 = vector.load %arg8[%c6_279, %c0_280, %c0_281] : memref<7x8x10xf32, #tpu.memory_space<vmem>>, vector<1x8x10xf32>
    %674 = vector.shape_cast %673 : vector<1x8x10xf32> to vector<8x10xf32>
    %675 = vector.shape_cast %672 : vector<8x10xf32> to vector<1x8x10xf32>
    tpu.vector_store %arg8[%c6_279, %c0_280, %c0_281], %675 {strides = array<i32>} : memref<7x8x10xf32, #tpu.memory_space<vmem>>, vector<1x8x10xf32>,
    return
  }
  func.func @transform_0(%arg0: i32) -> (i32, i32, i32) {
    %c0_i32 = arith.constant 0 : i32
    %c0_i32_0 = arith.constant 0 : i32
    %c0_i32_1 = arith.constant 0 : i32
    return %c0_i32, %c0_i32_0, %arg0 : i32, i32, i32
  }
  func.func @transform_1(%arg0: i32) -> (i32, i32) {
    %c0_i32 = arith.constant 0 : i32
    %c0_i32_0 = arith.constant 0 : i32
    %c0_i32_1 = arith.constant 0 : i32
    return %c0_i32, %c0_i32_0 : i32, i32
  }
  func.func @transform_2(%arg0: i32) -> i32 {
    %c0_i32 = arith.constant 0 : i32
    %c0_i32_0 = arith.constant 0 : i32
    return %c0_i32 : i32
  }
  func.func @transform_3(%arg0: i32) -> (i32, i32) {
    %c0_i32 = arith.constant 0 : i32
    %c0_i32_0 = arith.constant 0 : i32
    %c0_i32_1 = arith.constant 0 : i32
    return %c0_i32, %c0_i32_0 : i32, i32
  }
  func.func @transform_4(%arg0: i32) -> i32 {
    %c0_i32 = arith.constant 0 : i32
    %c0_i32_0 = arith.constant 0 : i32
    return %c0_i32 : i32
  }
  func.func @transform_5(%arg0: i32) -> i32 {
    %c0_i32 = arith.constant 0 : i32
    %c0_i32_0 = arith.constant 0 : i32
    return %c0_i32 : i32
  }
  func.func @transform_6(%arg0: i32) -> i32 {
    %c0_i32 = arith.constant 0 : i32
    %c0_i32_0 = arith.constant 0 : i32
    return %c0_i32 : i32
  }
  func.func @transform_7(%arg0: i32) -> (i32, i32, i32) {
    %c0_i32 = arith.constant 0 : i32
    %c0_i32_0 = arith.constant 0 : i32
    %c0_i32_1 = arith.constant 0 : i32
    return %c0_i32, %c0_i32_0, %arg0 : i32, i32, i32
  }
}

</mosaic_0001>

<bundles_post_ra>
// kernel: tpu_custom_call.1
= control target key start
LH: loop header
LB: loop body
LE: loop exit
PB: predicated region body
PF: predicated region fallthrough
CT: control target
= control target key end

     0   :  { %12 = vsyncpa [#allocation3], 0  ;;  %s1834_s0 = inlined_call_operand.hbm [shape: f32[7,8,10], index: 0, kind: input, shape index: {}]   ;;  %s1835_s1 = inlined_call_operand.hbm [shape: f32[7,7], index: 1, kind: input, shape index: {}]   ;;  %s1836_s2 = inlined_call_operand.vmem [shape: f32[7], index: 2, kind: input, shape index: {}]   ;;  %s1837_s3 = inlined_call_operand.vmem [shape: f32[7,7], index: 3, kind: input, shape index: {}]   ;;  %s1838_s4 = inlined_call_operand.vmem [shape: f32[7], index: 4, kind: input, shape index: {}]   ;;  %s1839_s5 = inlined_call_operand.vmem [shape: f32[7], index: 5, kind: input, shape index: {}]   ;;  %s1840_s6 = inlined_call_operand.vmem [shape: f32[7], index: 6, kind: input, shape index: {}]   ;;  %s1841_s7 = inlined_call_operand.hbm [shape: f32[7,8,10], index: 7, kind: output, shape index: {}]  }
   0x1   :  { %13 = vsyncpa [#allocation5], 0 }
   0x2   :  { %14 = vsyncpa [#allocation6], 0 }
   0x3   :  { %15 = vsyncpa [#allocation10], 0 }
   0x4   :  { %16 = vsyncpa [#allocation13], 0  ;;  %s54_s26 = sshll.u32 %s1837_s3, 4  ;;  %s55_s26 = int_to_ptr.vmem [resolvable:$true] %s54_s26 }
   0x5   :  { %17 = vsyncpa [#allocation4], 0  ;;  %s74_s29 = sshll.u32 %s1839_s5, 4  ;;  %s1026_s30 = scalar_lea.vmem %s55_s26, 128  ;;  %s75_s29 = int_to_ptr.vmem [resolvable:$true] %s74_s29 }
   0x6   :  { %p1027_p0 = scmp.ne.s32.totalorder %s55_s26, %s1026_s30  ;;  %p1031_p1 = scmp.lt.s32.totalorder %s55_s26, %s55_s26 }
   0x7   :  { %p1032_p2 = scmp.lt.s32.totalorder %s1026_s30, %s1026_s30 }
   0x9   :  { %p1033_p3 = por %p1032_p2, %p1031_p1 }
   0xb   :  { %p1034_p4 = pnand %p1033_p3, %p1027_p0 }
   0xd   :  { %1037 = shalt.err (!%p1034_p4)
}
   0xe   :  { %s1152_s8 = smov [#allocation9]   ;;  %s1038_s9 = scalar_lea.vmem %s75_s29, 16 }
   0xf   :  { %57 = dma.vmem_to_smem %s55_s26, 128, %s1152_s8, [#allocation10]  }
  0x10   :  { %p1039_p5 = scmp.ne.s32.totalorder %s75_s29, %s1038_s9  ;;  %p1043_p6 = scmp.lt.s32.totalorder %s75_s29, %s75_s29 }
  0x11   :  { %p1044_p7 = scmp.lt.s32.totalorder %s1038_s9, %s1038_s9 }
  0x13   :  { %p1045_p8 = por %p1044_p7, %p1043_p6 }
  0x15   :  { %p1046_p9 = pnand %p1045_p8, %p1039_p5 }
  0x17   :  { %1049 = shalt.err (!%p1046_p9)
}
  0x18   :  { %s1153_s3 = smov [#allocation12]   ;;  %s1154_s5 = smov [#allocation2]  }
  0x19   :  { %77 = dma.vmem_to_smem %s75_s29, 16, %s1153_s3, [#allocation13]  }
  0x1a   :  { %s23_s10 = sshll.u32 %s1154_s5, 4  ;;  %s1050_s13 = scalar_lea.hbm %s1834_s0, 896  ;;  %s24_s10 = int_to_ptr.vmem [resolvable:$true] %s23_s10 }
  0x1b   :  { %p1051_p10 = scmp.ne.s32.totalorder %s1834_s0, %s1050_s13  ;;  %p1054_p11 = scmp.lt.u32.totalorder %s1050_s13, %s1834_s0 }
  0x1d   :  { %p1056_p12 = pnand %p1054_p11, %p1051_p10 }
  0x1f   :  { %1059 = shalt.err (!%p1056_p12)
}
  0x20   :  { %s1060_s18 = scalar_lea.vmem %s24_s10, 896  ;;  %p1065_p0 = scmp.lt.s32.totalorder %s24_s10, %s24_s10 }
  0x21   :  { %p1061_p13 = scmp.ne.s32.totalorder %s24_s10, %s1060_s18  ;;  %p1066_p1 = scmp.lt.s32.totalorder %s1060_s18, %s1060_s18 }
  0x23   :  { %p1067_p2 = por %p1066_p1, %p1065_p0 }
  0x25   :  { %p1068_p3 = pnand %p1067_p2, %p1061_p13 }
  0x27   :  { %1071 = shalt.err (!%p1068_p3)
}
  0x28   :  { %s1155_s19 = smov 128   ;;  %s1156_s20 = smov 8  }
  0x29   :  { %29 = dma.hbm_to_vmem [thread:$0]  %s1834_s0, 896, %s24_s10, [#allocation3], %s1155_s19, %s1155_s19, %s1156_s20  }
  0x2a   :  { %s1072_s25 = scalar_lea.hbm %s1835_s1, 128 }
  0x2b   :  { %p1073_p4 = scmp.ne.s32.totalorder %s1835_s1, %s1072_s25  ;;  %p1076_p5 = scmp.lt.u32.totalorder %s1072_s25, %s1835_s1 }
  0x2d   :  { %p1078_p6 = pnand %p1076_p5, %p1073_p4 }
  0x2f   :  { %1081 = shalt.err (!%p1078_p6)
}
  0x30   :  { %s1157_s30 = smov [#allocation7]   ;;  %s44_s5 = sshll.u32 %s1836_s2, 4  ;;  %s45_s5 = int_to_ptr.vmem [resolvable:$true] %s44_s5 }
  0x31   :  { %37 = dma.hbm_to_smem %s1835_s1, 128, %s1157_s30, [#allocation5]  }
  0x32   :  { %s64_s12 = sshll.u32 %s1838_s4, 4  ;;  %s1082_s13 = scalar_lea.vmem %s45_s5, 16  ;;  %s65_s12 = int_to_ptr.vmem [resolvable:$true] %s64_s12 }
  0x33   :  { %p1083_p7 = scmp.ne.s32.totalorder %s45_s5, %s1082_s13  ;;  %p1087_p8 = scmp.lt.s32.totalorder %s45_s5, %s45_s5 }
  0x34   :  { %p1088_p9 = scmp.lt.s32.totalorder %s1082_s13, %s1082_s13 }
  0x36   :  { %p1089_p10 = por %p1088_p9, %p1087_p8 }
  0x38   :  { %p1090_p11 = pnand %p1089_p10, %p1083_p7 }
  0x3a   :  { %1093 = shalt.err (!%p1090_p11)
}
  0x3b   :  { %s1158_s14 = smov [#allocation8]   ;;  %s1094_s1 = scalar_lea.vmem %s65_s12, 16 }
  0x3c   :  { %47 = dma.vmem_to_smem %s45_s5, 16, %s1158_s14, [#allocation6]  }
  0x3d   :  { %p1095_p12 = scmp.ne.s32.totalorder %s65_s12, %s1094_s1  ;;  %p1099_p13 = scmp.lt.s32.totalorder %s65_s12, %s65_s12 }
  0x3e   :  { %p1100_p0 = scmp.lt.s32.totalorder %s1094_s1, %s1094_s1 }
  0x40   :  { %p1101_p1 = por %p1100_p0, %p1099_p13 }
  0x42   :  { %p1102_p2 = pnand %p1101_p1, %p1095_p12 }
  0x44   :  { %1105 = shalt.err (!%p1102_p2)
}
  0x45   :  { %s1159_s2 = smov [#allocation11]   ;;  %s84_s16 = sshll.u32 %s1840_s6, 4  ;;  %s85_s16 = int_to_ptr.vmem [resolvable:$true] %s84_s16 }
  0x46   :  { %67 = dma.vmem_to_smem %s65_s12, 16, %s1159_s2, [#allocation10]  }
  0x47   :  { %s1106_s17 = scalar_lea.vmem %s85_s16, 16  ;;  %p1111_p4 = scmp.lt.s32.totalorder %s85_s16, %s85_s16 }
  0x48   :  { %p1107_p3 = scmp.ne.s32.totalorder %s85_s16, %s1106_s17  ;;  %p1112_p5 = scmp.lt.s32.totalorder %s1106_s17, %s1106_s17 }
  0x4a   :  { %p1113_p6 = por %p1112_p5, %p1111_p4 }
  0x4c   :  { %p1114_p7 = pnand %p1113_p6, %p1107_p3 }
  0x4e   :  { %1117 = shalt.err (!%p1114_p7)
}
  0x4f   :  { %s1160_s18 = smov [#allocation14]  }
  0x50   :  { %87 = dma.vmem_to_smem %s85_s16, 16, %s1160_s18, [#allocation13]  }
  0x51   :  { %1140 = dma.done.wait [#allocation3], 896  }
  0x52   :  { %1141 = vsyncadd [#allocation3], 4294966400 }
  0x53   :  { %1142 = dma.done.wait [#allocation5], 128  }
  0x54   :  { %1143 = vsyncadd [#allocation5], 4294967168 }
  0x55   :  { %1144 = dma.done.wait [#allocation6], 16  }
  0x56   :  { %1145 = vsyncadd [#allocation6], 4294967280 }
  0x57   :  { %1146 = dma.done.wait [#allocation10], 144  }
  0x58   :  { %1147 = vsyncadd [#allocation10], 4294967152 }
  0x59   :  { %1148 = dma.done.wait [#allocation13], 32  }
  0x5a   :  { %1149 = vsyncadd [#allocation13], 4294967264 }
  0x5b   :  { %109 = sfence }
  0x5c   :  { %s123_s6 = sld [smem:[#allocation7]]  ;;  %v1250_v0 = vld [vmem:[#allocation2] sm:$0xff]  ;;  %v1256_v1 = vld [vmem:[#allocation2 + $0x8] sm:$0xff]  ;;  %s1258_s28 = sld [smem:[#allocation7 + $0x1]]  ;;  %v1262_v2 = vld [vmem:[#allocation2 + $0x10] sm:$0xff]  ;;  %vm550_vm0 = vcmask 80896  }
  0x5d   :  { %s845_s21 = sld [smem:[#allocation7 + $0x80]]  ;;  %s1260_s29 = sld [smem:[#allocation7 + $0x81]]  ;;  %v1268_v4 = vld [vmem:[#allocation2 + $0x18] sm:$0xff]  ;;  %v1270_v5 = vld [vmem:[#allocation2 + $0x20] sm:$0xff]  ;;  %v1277_v8 = vld [vmem:[#allocation2 + $0x28] sm:$0xff] }
  0x5e   :  { %s846_s22 = sld [smem:[#allocation7 + $0x100]]  ;;  %s1264_s30 = sld [smem:[#allocation7 + $0x101]]  ;;  %v1298_v18 = vld [vmem:[#allocation2 + $0x30] sm:$0xff] }
  0x5f   :  { %s1244_s23 = sld [smem:[#allocation7 + $0x180]]  ;;  %s1266_s8 = sld [smem:[#allocation7 + $0x181]] }
  0x60   :  { %s1246_s24 = sld [smem:[#allocation7 + $0x200]]  ;;  %s1273_s9 = sld [smem:[#allocation7 + $0x201]] }
  0x61   :  { %s1248_s25 = sld [smem:[#allocation7 + $0x280]]  ;;  %s1275_s0 = sld [smem:[#allocation7 + $0x281]] }
  0x62   :  { %s1252_s26 = sld [smem:[#allocation7 + $0x300]]  ;;  %v124_v3 = vstv %s123_s6  ;;  %s1281_s3 = sld [smem:[#allocation7 + $0x301]]  ;;  %v155_v21 = vstv %s1258_s28 }
  0x63   :  { %s1254_s27 = sld [smem:[#allocation8]]  ;;  %v125_v6 = vmul.f32 %v124_v3, %v1250_v0  ;;  %v127_v7 = vstv %s845_s21  ;;  %s1283_s5 = sld [smem:[#allocation8 + $0x1]]  ;;  %v158_v22 = vstv %s1260_s29  ;;  %v156_v24 = vmul.f32 %v155_v21, %v1250_v0 }
  0x64   :  { %v128_v9 = vmul.f32 %v127_v7, %v1256_v1  ;;  %v131_v10 = vstv %s846_s22  ;;  %s1288_s10 = sld [smem:[#allocation7 + $0x2]]  ;;  %v159_v25 = vmul.f32 %v158_v22, %v1256_v1  ;;  %v162_v26 = vstv %s1264_s30  ;;  %s1317_s4 = sld [smem:[#allocation7 + $0x3]] }
  0x65   :  { %v135_v11 = vstv %s1244_s23  ;;  %v132_v12 = vmul.f32 %v131_v10, %v1262_v2  ;;  %s1290_s11 = sld [smem:[#allocation7 + $0x82]]  ;;  %v163_v27 = vmul.f32 %v162_v26, %v1262_v2  ;;  %v166_v28 = vstv %s1266_s8  ;;  %s1319_s15 = sld [smem:[#allocation7 + $0x83]] }
  0x66   :  { %v139_v13 = vstv %s1246_s24  ;;  %v129_v15 = vadd.f32 %v128_v9, %v125_v6  ;;  %v136_v16 = vmul.f32 %v135_v11, %v1268_v4  ;;  %s1294_s12 = sld [smem:[#allocation7 + $0x102]]  ;;  %v170_v29 = vstv %s1273_s9  ;;  %s1323_s16 = sld [smem:[#allocation7 + $0x103]] }
  0x67   :  { %v143_v14 = vstv %s1248_s25  ;;  %v140_v17 = vmul.f32 %v139_v13, %v1270_v5  ;;  %s1296_s13 = sld [smem:[#allocation7 + $0x182]]  ;;  %v174_v30 = vstv %s1275_s0  ;;  %v160_v33 = vadd.f32 %v159_v25, %v156_v24  ;;  %s1329_s17 = sld [smem:[#allocation7 + $0x183]] }
  0x68   :  { %v144_v19 = vmul.f32 %v143_v14, %v1277_v8  ;;  %v147_v20 = vstv %s1252_s26  ;;  %s1304_s14 = sld [smem:[#allocation7 + $0x202]]  ;;  %v133_v23 = vadd.f32 %v132_v12, %v129_v15  ;;  %v167_v34 = vmul.f32 %v166_v28, %v1268_v4  ;;  %s1331_s18 = sld [smem:[#allocation7 + $0x203]] }
  0x69   :  { %s1306_s1 = sld [smem:[#allocation7 + $0x282]]  ;;  %v148_v32 = vmul.f32 %v147_v20, %v1298_v18  ;;  %v151_v35 = vstv %s1254_s27  ;;  %v171_v36 = vmul.f32 %v170_v29, %v1270_v5  ;;  %v175_v37 = vmul.f32 %v174_v30, %v1277_v8  ;;  %s1341_s21 = sld [smem:[#allocation7 + $0x283]] }
  0x6a   :  { %s1311_s2 = sld [smem:[#allocation7 + $0x302]]  ;;  %v137_v31 = vadd.f32 %v136_v16, %v133_v23  ;;  %v186_v38 = vstv %s1288_s10  ;;  %v164_v40 = vadd.f32 %v163_v27, %v160_v33  ;;  %v178_v41 = vstv %s1281_s3  ;;  %s1345_s22 = sld [smem:[#allocation7 + $0x303]] }
  0x6b   :  { %v187_v42 = vmul.f32 %v186_v38, %v1250_v0  ;;  %v189_v43 = vstv %s1290_s11  ;;  %s1339_s6 = sld [smem:[#allocation8 + $0x2]]  ;;  %v179_v51 = vmul.f32 %v178_v41, %v1298_v18  ;;  %v182_v52 = vstv %s1283_s5  ;;  %s1351_s23 = sld [smem:[#allocation7 + $0x4]] }
  0x6c   :  { %v141_v39 = vadd.f32 %v140_v17, %v137_v31  ;;  %v193_v44 = vstv %s1294_s12  ;;  %v168_v48 = vadd.f32 %v167_v34, %v164_v40  ;;  %v190_v49 = vmul.f32 %v189_v43, %v1256_v1  ;;  %s1354_s24 = sld [smem:[#allocation7 + $0x84]]  ;;  %s1365_s27 = sld [smem:[#allocation8 + $0x3]] }
  0x6d   :  { %v197_v45 = vstv %s1296_s13  ;;  %v194_v50 = vmul.f32 %v193_v44, %v1262_v2  ;;  %v217_v61 = vstv %s1317_s4  ;;  %v220_v62 = vstv %s1319_s15  ;;  %s1360_s25 = sld [smem:[#allocation7 + $0x104]]  ;;  %s1382_s8 = sld [smem:[#allocation7 + $0x5]] }
  0x6e   :  { %v201_v46 = vstv %s1304_s14  ;;  %v145_v47 = vadd.f32 %v144_v19, %v141_v39  ;;  %v198_v53 = vmul.f32 %v197_v45, %v1268_v4  ;;  %v172_v56 = vadd.f32 %v171_v36, %v168_v48  ;;  %s1362_s26 = sld [smem:[#allocation7 + $0x184]]  ;;  %s1386_s9 = sld [smem:[#allocation7 + $0x85]] }
  0x6f   :  { %v205_v54 = vstv %s1306_s1  ;;  %v191_v57 = vadd.f32 %v190_v49, %v187_v42  ;;  %v202_v58 = vmul.f32 %v201_v46, %v1270_v5  ;;  %v218_v7 = vmul.f32 %v217_v61, %v1250_v0  ;;  %s1367_s28 = sld [smem:[#allocation7 + $0x204]]  ;;  %s1388_s0 = sld [smem:[#allocation7 + $0x105]] }
  0x70   :  { %v149_v55 = vadd.f32 %v148_v32, %v145_v47  ;;  %v206_v59 = vmul.f32 %v205_v54, %v1277_v8  ;;  %v209_v60 = vstv %s1311_s2  ;;  %v176_v3 = vadd.f32 %v175_v37, %v172_v56  ;;  %s1373_s29 = sld [smem:[#allocation7 + $0x284]]  ;;  %s1392_s3 = sld [smem:[#allocation7 + $0x185]] }
  0x71   :  { %v195_v6 = vadd.f32 %v194_v50, %v191_v57  ;;  %v221_v9 = vmul.f32 %v220_v62, %v1256_v1  ;;  %v224_v10 = vstv %s1323_s16  ;;  %v228_v11 = vstv %s1329_s17  ;;  %s1380_s30 = sld [smem:[#allocation7 + $0x304]]  ;;  %s1397_s5 = sld [smem:[#allocation7 + $0x205]] }
  0x72   :  { %v152_v63 = vadd.f32 %v151_v35, %v149_v55  ;;  %v232_v12 = vstv %s1331_s18  ;;  %v180_v13 = vadd.f32 %v179_v51, %v176_v3  ;;  %v210_v15 = vmul.f32 %v209_v60, %v1298_v18  ;;  %s1399_s10 = sld [smem:[#allocation7 + $0x285]]  ;;  %s1407_s11 = sld [smem:[#allocation8 + $0x4]] }
  0x73   :  { %v199_v14 = vadd.f32 %v198_v53, %v195_v6  ;;  %v225_v16 = vmul.f32 %v224_v10, %v1262_v2  ;;  %v213_v17 = vstv %s1339_s6  ;;  %v222_v19 = vadd.f32 %v221_v9, %v218_v7  ;;  %s1409_s12 = sld [smem:[#allocation7 + $0x305]]  ;;  %s1413_s13 = sld [smem:[#allocation7 + $0x6]] }
  0x74   :  { %v229_v20 = vmul.f32 %v228_v11, %v1268_v4  ;;  %v236_v21 = vstv %s1341_s21  ;;  %975 = vtanh.f32 %v152_v63  ;;  %v233_v23 = vmul.f32 %v232_v12, %v1270_v5  ;;  %s1415_s14 = sld [smem:[#allocation7 + $0x86]]  ;;  %s1432_s15 = sld [smem:[#allocation8 + $0x5]] }
  0x75   :  { %v203_v22 = vadd.f32 %v202_v58, %v199_v14  ;;  %v240_v24 = vstv %s1345_s22  ;;  %v183_v25 = vadd.f32 %v182_v52, %v180_v13  ;;  %v226_v26 = vadd.f32 %v225_v16, %v222_v19  ;;  %s1419_s1 = sld [smem:[#allocation7 + $0x106]]  ;;  %s1444_s18 = sld [smem:[#allocation9]] }
  0x76   :  { %v237_v27 = vmul.f32 %v236_v21, %v1277_v8  ;;  %v248_v28 = vstv %s1351_s23  ;;  %v241_v30 = vmul.f32 %v240_v24, %v1298_v18  ;;  %v251_v32 = vstv %s1354_s24  ;;  %s1421_s2 = sld [smem:[#allocation7 + $0x186]]  ;;  %s1447_s6 = sld [smem:[#allocation9 + $0x80]] }
  0x77   :  { %v207_v29 = vadd.f32 %v206_v59, %v203_v22  ;;  %v249_v31 = vmul.f32 %v248_v28, %v1250_v0  ;;  %v230_v33 = vadd.f32 %v229_v20, %v226_v26  ;;  %v252_v34 = vmul.f32 %v251_v32, %v1256_v1  ;;  %s1428_s4 = sld [smem:[#allocation7 + $0x206]]  ;;  %s1453_s21 = sld [smem:[#allocation9 + $0x100]] }
  0x78   :  { %v255_v35 = vstv %s1360_s25  ;;  %v259_v36 = vstv %s1362_s26  ;;  %v244_v38 = vstv %s1365_s27  ;;  %v263_v40 = vstv %s1367_s28  ;;  %s1434_s16 = sld [smem:[#allocation7 + $0x286]]  ;;  %s1455_s22 = sld [smem:[#allocation9 + $0x180]] }
  0x79   :  { %v211_v37 = vadd.f32 %v210_v15, %v207_v29  ;;  %v256_v39 = vmul.f32 %v255_v35, %v1262_v2  ;;  %v234_v41 = vadd.f32 %v233_v23, %v230_v33  ;;  %v253_v42 = vadd.f32 %v252_v34, %v249_v31  ;;  %s1442_s17 = sld [smem:[#allocation7 + $0x306]]  ;;  %s1464_s24 = sld [smem:[#allocation9 + $0x200]] }
  0x7a   :  { %v260_v43 = vmul.f32 %v259_v36, %v1268_v4  ;;  %v267_v44 = vstv %s1373_s29  ;;  %977 = vtanh.f32 %v183_v25  ;;  %v264_v46 = vmul.f32 %v263_v40, %v1270_v5  ;;  %s1458_s23 = sld [smem:[#allocation8 + $0x6]]  ;;  %s1466_s25 = sld [smem:[#allocation9 + $0x1]] }
  0x7b   :  { %v214_v45 = vadd.f32 %v213_v17, %v211_v37  ;;  %v268_v47 = vmul.f32 %v267_v44, %v1277_v8  ;;  %v238_v48 = vadd.f32 %v237_v27, %v234_v41  ;;  %v257_v49 = vadd.f32 %v256_v39, %v253_v42  ;;  %s1470_s26 = sld [smem:[#allocation9 + $0x81]]  ;;  %s1482_s29 = sld [smem:[#allocation9 + $0x280]] }
  0x7c   :  { %v271_v50 = vstv %s1380_s30  ;;  %v279_v51 = vstv %s1382_s8  ;;  %v282_v53 = vstv %s1386_s9  ;;  %v286_v54 = vstv %s1388_s0  ;;  %s1477_s27 = sld [smem:[#allocation9 + $0x101]]  ;;  %s1490_s30 = sld [smem:[#allocation9 + $0x300]] }
  0x7d   :  { %979 = vtanh.f32 %v214_v45  ;;  %v280_v52 = vmul.f32 %v279_v51, %v1250_v0  ;;  %v242_v55 = vadd.f32 %v241_v30, %v238_v48  ;;  %v261_v56 = vadd.f32 %v260_v43, %v257_v49  ;;  %s1479_s28 = sld [smem:[#allocation9 + $0x181]]  ;;  %s1492_s8 = sld [smem:[#allocation11]] }
  0x7e   :  { %v283_v57 = vmul.f32 %v282_v53, %v1256_v1  ;;  %v287_v58 = vmul.f32 %v286_v54, %v1262_v2  ;;  %v1436_v59 = vpop.eup %975  ;;  %v272_v60 = vmul.f32 %v271_v50, %v1298_v18  ;;  %v290_v61 = vstv %s1392_s3  ;;  %s1495_s9 = sld [smem:[#allocation9 + $0x201]]  ;;  %s1497_s0 = sld [smem:[#allocation9 + $0x2]] }
  0x7f   :  { %v294_v62 = vstv %s1397_s5  ;;  %v298_v63 = vstv %s1399_s10  ;;  %v245_v3 = vadd.f32 %v244_v38, %v242_v55  ;;  %v265_v6 = vadd.f32 %v264_v46, %v261_v56  ;;  %s1503_s3 = sld [smem:[#allocation9 + $0x82]] }
  0x80   :  { %v284_v7 = vadd.f32 %v283_v57, %v280_v52  ;;  %v291_v9 = vmul.f32 %v290_v61, %v1268_v4  ;;  %v275_v10 = vstv %s1407_s11  ;;  %v295_v11 = vmul.f32 %v294_v62, %v1270_v5  ;;  %s1505_s5 = sld [smem:[#allocation9 + $0x102]]  ;;  %s1518_s11 = sld [smem:[#allocation9 + $0x281]] }
  0x81   :  { %v299_v12 = vmul.f32 %v298_v63, %v1277_v8  ;;  %v302_v13 = vstv %s1409_s12  ;;  %981 = vtanh.f32 %v245_v3  ;;  %v269_v14 = vadd.f32 %v268_v47, %v265_v6  ;;  %s1513_s10 = sld [smem:[#allocation9 + $0x182]]  ;;  %s1520_s12 = sld [smem:[#allocation9 + $0x301]] }
  0x82   :  { %v288_v15 = vadd.f32 %v287_v58, %v284_v7  ;;  %v310_v16 = vstv %s1413_s13  ;;  %v313_v19 = vstv %s1415_s14  ;;  %v317_v20 = vstv %s1419_s1  ;;  %s1526_s13 = sld [smem:[#allocation9 + $0x202]]  ;;  %s1531_s1 = sld [smem:[#allocation9 + $0x3]] }
  0x83   :  { %v311_v17 = vmul.f32 %v310_v16, %v1250_v0  ;;  %v321_v21 = vstv %s1421_s2  ;;  %v273_v22 = vadd.f32 %v272_v60, %v269_v14  ;;  %v314_v24 = vmul.f32 %v313_v19, %v1256_v1  ;;  %s1528_s14 = sld [smem:[#allocation9 + $0x282]]  ;;  %s1533_s2 = sld [smem:[#allocation9 + $0x83]] }
  0x84   :  { %v292_v23 = vadd.f32 %v291_v9, %v288_v15  ;;  %v318_v25 = vmul.f32 %v317_v20, %v1262_v2  ;;  %v1472_v0 = vpop.eup %977  ;;  %v303_v26 = vmul.f32 %v302_v13, %v1298_v18  ;;  %v322_v27 = vmul.f32 %v321_v21, %v1268_v4 }
  0x85   :  { %v325_v28 = vstv %s1428_s4  ;;  %v276_v29 = vadd.f32 %v275_v10, %v273_v22  ;;  %v315_v1 = vadd.f32 %v314_v24, %v311_v17  ;;  %v329_v31 = vstv %s1434_s16  ;;  %s1539_s4 = sld [smem:[#allocation9 + $0x103]] }
  0x86   :  { %v296_v30 = vadd.f32 %v295_v11, %v292_v23  ;;  %v306_v32 = vstv %s1432_s15  ;;  %v326_v33 = vmul.f32 %v325_v28, %v1270_v5  ;;  %v333_v4 = vstv %s1442_s17  ;;  %s1541_s15 = sld [smem:[#allocation9 + $0x183]] }
  0x87   :  { %v1484_v2 = vpop.eup %979  ;;  %v341_v34 = vstv %s1444_s18  ;;  %983 = vtanh.f32 %v276_v29  ;;  %v319_v36 = vadd.f32 %v318_v25, %v315_v1  ;;  %v330_v5 = vmul.f32 %v329_v31, %v1277_v8  ;;  %s1552_s16 = sld [smem:[#allocation9 + $0x203]]  ;;  %s1560_s18 = sld [smem:[#allocation9 + $0x302]] }
  0x88   :  { %v300_v35 = vadd.f32 %v299_v12, %v296_v30  ;;  %v342_v37 = vmul.f32 %v1436_v59, %v341_v34  ;;  %v344_v38 = vstv %s1447_s6  ;;  %v348_v39 = vstv %s1453_s21  ;;  %s1554_s17 = sld [smem:[#allocation9 + $0x283]]  ;;  %s1565_s21 = sld [smem:[#allocation9 + $0x4]] }
  0x89   :  { %v352_v40 = vstv %s1455_s22  ;;  %v323_v42 = vadd.f32 %v322_v27, %v319_v36  ;;  %v345_v43 = vmul.f32 %v1472_v0, %v344_v38  ;;  %v349_v44 = vmul.f32 %v1484_v2, %v348_v39  ;;  %s1562_s6 = sld [smem:[#allocation9 + $0x303]]  ;;  %s1567_s22 = sld [smem:[#allocation9 + $0x84]] }
  0x8a   :  { %v304_v41 = vadd.f32 %v303_v26, %v300_v35  ;;  %v334_v45 = vmul.f32 %v333_v4, %v1298_v18  ;;  %v337_v46 = vstv %s1458_s23  ;;  %v356_v8 = vstv %s1464_s24  ;;  %s1572_s23 = sld [smem:[#allocation9 + $0x104]] }
  0x8b   :  { %v371_v47 = vstv %s1466_s25  ;;  %v1515_v48 = vpop.eup %981  ;;  %v327_v50 = vadd.f32 %v326_v33, %v323_v42  ;;  %v346_v51 = vadd.f32 %v345_v43, %v342_v37  ;;  %v374_v53 = vstv %s1470_s26  ;;  %s1574_s24 = sld [smem:[#allocation9 + $0x184]]  ;;  %s1591_s26 = sld [smem:[#allocation11 + $0x1]] }
  0x8c   :  { %v307_v49 = vadd.f32 %v306_v32, %v304_v41  ;;  %v372_v52 = vmul.f32 %v1436_v59, %v371_v47  ;;  %v353_v18 = vmul.f32 %v1515_v48, %v352_v40  ;;  %v378_v54 = vstv %s1477_s27  ;;  %s1587_s25 = sld [smem:[#allocation9 + $0x204]]  ;;  %s1594_s27 = sld [smem:[#allocation11 + $0x2]] }
  0x8d   :  { %v382_v55 = vstv %s1479_s28  ;;  %v331_v56 = vadd.f32 %v330_v5, %v327_v50  ;;  %v350_v57 = vadd.f32 %v349_v44, %v346_v51  ;;  %v375_v58 = vmul.f32 %v1472_v0, %v374_v53  ;;  %s1599_s28 = sld [smem:[#allocation9 + $0x284]] }
  0x8e   :  { %985 = vtanh.f32 %v307_v49  ;;  %v360_v60 = vstv %s1482_s29  ;;  %v364_v61 = vstv %s1490_s30  ;;  %v368_v62 = vstv %s1492_s8  ;;  %s1603_s29 = sld [smem:[#allocation11 + $0x3]]  ;;  %s1638_s30 = sld [smem:[#allocation9 + $0x285]] }
  0x8f   :  { %v379_v63 = vmul.f32 %v1484_v2, %v378_v54  ;;  %v335_v3 = vadd.f32 %v334_v45, %v331_v56  ;;  %v376_v6 = vadd.f32 %v375_v58, %v372_v52  ;;  %v383_v7 = vmul.f32 %v1515_v48, %v382_v55  ;;  %s1674_s8 = sld [smem:[#allocation9 + $0x286]] }
  0x90   :  { %v386_v9 = vstv %s1495_s9  ;;  %v354_v10 = vadd.f32 %v353_v18, %v350_v57  ;;  %v401_v11 = vstv %s1497_s0  ;;  %v404_v12 = vstv %s1503_s3  ;;  %s1605_s9 = sld [smem:[#allocation9 + $0x304]]  ;;  %s1609_s0 = sld [smem:[#allocation9 + $0x5]] }
  0x91   :  { %v408_v13 = vstv %s1505_s5  ;;  %v1548_v14 = vpop.eup %983  ;;  %v338_v15 = vadd.f32 %v337_v46, %v335_v3  ;;  %v380_v16 = vadd.f32 %v379_v63, %v376_v6  ;;  %v402_v17 = vmul.f32 %v1436_v59, %v401_v11  ;;  %s1611_s3 = sld [smem:[#allocation9 + $0x85]] }
  0x92   :  { %v405_v19 = vmul.f32 %v1472_v0, %v404_v12  ;;  %v357_v20 = vmul.f32 %v1548_v14, %v356_v8  ;;  %v387_v21 = vmul.f32 %v1548_v14, %v386_v9  ;;  %v409_v22 = vmul.f32 %v1484_v2, %v408_v13  ;;  %s1617_s5 = sld [smem:[#allocation9 + $0x105]] }
  0x93   :  { %v412_v23 = vstv %s1513_s10  ;;  %987 = vtanh.f32 %v338_v15  ;;  %v384_v24 = vadd.f32 %v383_v7, %v380_v16  ;;  %v390_v28 = vstv %s1518_s11  ;;  %s1619_s10 = sld [smem:[#allocation9 + $0x185]]  ;;  %s1632_s11 = sld [smem:[#allocation11 + $0x4]] }
  0x94   :  { %v406_v25 = vadd.f32 %v405_v19, %v402_v17  ;;  %v413_v26 = vmul.f32 %v1515_v48, %v412_v23  ;;  %v358_v27 = vadd.f32 %v357_v20, %v354_v10  ;;  %v394_v29 = vstv %s1520_s12  ;;  %s1634_s12 = sld [smem:[#allocation9 + $0x205]] }
  0x95   :  { %v416_v30 = vstv %s1526_s13  ;;  %v388_v1 = vadd.f32 %v387_v21, %v384_v24  ;;  %v420_v33 = vstv %s1528_s14  ;;  %v431_v4 = vstv %s1531_s1  ;;  %s1642_s13 = sld [smem:[#allocation9 + $0x6]]  ;;  %s1648_s1 = sld [smem:[#allocation9 + $0x305]] }
  0x96   :  { %v410_v31 = vadd.f32 %v409_v22, %v406_v25  ;;  %v417_v32 = vmul.f32 %v1548_v14, %v416_v30  ;;  %v434_v34 = vstv %s1533_s2  ;;  %v438_v35 = vstv %s1539_s4  ;;  %s1644_s14 = sld [smem:[#allocation9 + $0x86]] }
  0x97   :  { %v442_v36 = vstv %s1541_s15  ;;  %v432_v38 = vmul.f32 %v1436_v59, %v431_v4  ;;  %v435_v39 = vmul.f32 %v1472_v0, %v434_v34  ;;  %v439_v40 = vmul.f32 %v1484_v2, %v438_v35  ;;  %s1650_s2 = sld [smem:[#allocation9 + $0x106]] }
  0x98   :  { %v1582_v37 = vpop.eup %985  ;;  %v414_v5 = vadd.f32 %v413_v26, %v410_v31  ;;  %v443_v44 = vmul.f32 %v1515_v48, %v442_v36  ;;  %v446_v8 = vstv %s1552_s16  ;;  %v450_v47 = vstv %s1554_s17  ;;  %s1658_s4 = sld [smem:[#allocation9 + $0x186]]  ;;  %s1665_s16 = sld [smem:[#allocation11 + $0x5]] }
  0x99   :  { %v361_v41 = vmul.f32 %v1582_v37, %v360_v60  ;;  %v391_v42 = vmul.f32 %v1582_v37, %v390_v28  ;;  %v421_v43 = vmul.f32 %v1582_v37, %v420_v33  ;;  %v436_v46 = vadd.f32 %v435_v39, %v432_v38  ;;  %s1660_s15 = sld [smem:[#allocation9 + $0x206]] }
  0x9a   :  { %v418_v45 = vadd.f32 %v417_v32, %v414_v5  ;;  %v424_v51 = vstv %s1560_s18  ;;  %v447_v52 = vmul.f32 %v1548_v14, %v446_v8  ;;  %v451_v54 = vmul.f32 %v1582_v37, %v450_v47  ;;  %s1676_s17 = sld [smem:[#allocation9 + $0x306]] }
  0x9b   :  { %v362_v49 = vadd.f32 %v361_v41, %v358_v27  ;;  %v392_v50 = vadd.f32 %v391_v42, %v388_v1  ;;  %v440_v53 = vadd.f32 %v439_v40, %v436_v46  ;;  %v454_v55 = vstv %s1562_s6  ;;  %s1703_s18 = sld [smem:[#allocation11 + $0x6]]  ;;  %s1770_s6 = sld [smem:[#allocation12]] }
  0x9c   :  { %v422_v18 = vadd.f32 %v421_v43, %v418_v45  ;;  %v461_v56 = vstv %s1565_s21  ;;  %v464_v57 = vstv %s1567_s22  ;;  %v468_v58 = vstv %s1572_s23  ;;  %s1772_s21 = sld [smem:[#allocation12 + $0x1]]  ;;  %s1774_s22 = sld [smem:[#allocation12 + $0x2]] }
  0x9d   :  { %v472_v60 = vstv %s1574_s24  ;;  %v1621_v63 = vpop.eup %987  ;;  %v444_v3 = vadd.f32 %v443_v44, %v440_v53  ;;  %v462_v6 = vmul.f32 %v1436_v59, %v461_v56  ;;  %v465_v7 = vmul.f32 %v1472_v0, %v464_v57  ;;  %s1776_s23 = sld [smem:[#allocation14]]  ;;  %s1778_s24 = sld [smem:[#allocation12 + $0x3]] }
  0x9e   :  { %v469_v9 = vmul.f32 %v1484_v2, %v468_v58  ;;  %v365_v10 = vmul.f32 %v1621_v63, %v364_v61  ;;  %v395_v11 = vmul.f32 %v1621_v63, %v394_v29  ;;  %v425_v12 = vmul.f32 %v1621_v63, %v424_v51 }
  0x9f   :  { %v455_v13 = vmul.f32 %v1621_v63, %v454_v55  ;;  %v448_v15 = vadd.f32 %v447_v52, %v444_v3  ;;  %v466_v16 = vadd.f32 %v465_v7, %v462_v6  ;;  %v473_v17 = vmul.f32 %v1515_v48, %v472_v60 }
  0xa0   :  { %v476_v19 = vstv %s1587_s25  ;;  %v366_v61 = vadd.f32 %v365_v10, %v362_v49  ;;  %v396_v20 = vadd.f32 %v395_v11, %v392_v50  ;;  %v398_v21 = vstv %s1591_s26  ;;  %s1780_s25 = sld [smem:[#allocation14 + $0x1]]  ;;  %s1782_s26 = sld [smem:[#allocation14 + $0x2]] }
  0xa1   :  { %v428_v22 = vstv %s1594_s27  ;;  %v452_v23 = vadd.f32 %v451_v54, %v448_v15  ;;  %v470_v24 = vadd.f32 %v469_v9, %v466_v16  ;;  %v477_v25 = vmul.f32 %v1548_v14, %v476_v19  ;;  %s1784_s27 = sld [smem:[#allocation14 + $0x3]] }
  0xa2   :  { %v480_v26 = vstv %s1599_s28  ;;  %v1654_v27 = vadd.f32 %v368_v62, %v366_v61  ;;  %v426_v28 = vadd.f32 %v425_v12, %v422_v18  ;;  %v458_v29 = vstv %s1603_s29  ;;  %s1786_s28 = sld [smem:[#allocation12 + $0x4]] }
  0xa3   :  { %v484_v30 = vstv %s1605_s9  ;;  %v1662_v1 = vadd.f32 %v398_v21, %v396_v20  ;;  %v456_v31 = vadd.f32 %v455_v13, %v452_v23  ;;  %v474_v32 = vadd.f32 %v473_v17, %v470_v24  ;;  %s1788_s29 = sld [smem:[#allocation14 + $0x4]]  ;;  %s1790_s9 = sld [smem:[#allocation12 + $0x5]] }
  0xa4   :  { %v481_v33 = vmul.f32 %v1582_v37, %v480_v26  ;;  %v491_v62 = vstv %s1609_s0  ;;  %v494_v4 = vstv %s1611_s3  ;;  %v498_v34 = vstv %s1617_s5  ;;  %s1792_s0 = sld [smem:[#allocation14 + $0x5]]  ;;  %s1794_s3 = sld [smem:[#allocation12 + $0x6]] }
  0xa5   :  { %v502_v35 = vstv %s1619_s10  ;;  %v478_v36 = vadd.f32 %v477_v25, %v474_v32  ;;  %v485_v5 = vmul.f32 %v1621_v63, %v484_v30  ;;  %v492_v38 = vmul.f32 %v1436_v59, %v491_v62  ;;  %s1796_s5 = sld [smem:[#allocation14 + $0x6]]  ;;  %s1161_s10 = smov [#allocation15]  }
  0xa6   :  { %v495_v39 = vmul.f32 %v1472_v0, %v494_v4  ;;  %v1678_v40 = vadd.f32 %v428_v22, %v426_v28  ;;  %v488_v41 = vstv %s1632_s11  ;;  %v499_v42 = vmul.f32 %v1484_v2, %v498_v34  ;;  %s829_s11 = sshll.u32 %s1161_s10, 4  ;;  %s830_s11 = int_to_ptr.vmem [resolvable:$true] %s829_s11 }
  0xa7   :  { %v506_v43 = vstv %s1634_s12  ;;  %v1683_v44 = vadd.f32 %v458_v29, %v456_v31  ;;  %v482_v45 = vadd.f32 %v481_v33, %v478_v36  ;;  %v503_v8 = vmul.f32 %v1515_v48, %v502_v35  ;;  %s1118_s12 = scalar_lea.vmem %s830_s11, 896  ;;  %p1123_p9 = scmp.lt.s32.totalorder %s830_s11, %s830_s11 }
  0xa8   :  { %v496_v46 = vadd.f32 %v495_v39, %v492_v38  ;;  %v507_v47 = vmul.f32 %v1548_v14, %v506_v43  ;;  %v510_v49 = vstv %s1638_s30  ;;  %v521_v50 = vstv %s1642_s13  ;;  %p1119_p8 = scmp.ne.s32.totalorder %s830_s11, %s1118_s12  ;;  %p1124_p10 = scmp.lt.s32.totalorder %s1118_s12, %s1118_s12 }
  0xa9   :  { %v524_v51 = vstv %s1644_s14  ;;  %v486_v52 = vadd.f32 %v485_v5, %v482_v45  ;;  %v514_v53 = vstv %s1648_s1  ;;  %v522_v54 = vmul.f32 %v1436_v59, %v521_v50 }
  0xaa   :  { %v500_v18 = vadd.f32 %v499_v42, %v496_v46  ;;  %v525_v55 = vmul.f32 %v1472_v0, %v524_v51  ;;  %v528_v56 = vstv %s1650_s2  ;;  %v532_v57 = vstv %s1658_s4  ;;  %p1125_p11 = por %p1124_p10, %p1123_p9 }
  0xab   :  { %v536_v58 = vstv %s1660_s15  ;;  %v511_v3 = vmul.f32 %v1582_v37, %v510_v49  ;;  %v518_v6 = vstv %s1665_s16  ;;  %v529_v7 = vmul.f32 %v1484_v2, %v528_v56 }
  0xac   :  { %v504_v60 = vadd.f32 %v503_v8, %v500_v18  ;;  %v1699_v9 = vadd.f32 %v488_v41, %v486_v52  ;;  %v515_v10 = vmul.f32 %v1621_v63, %v514_v53  ;;  %v526_v11 = vadd.f32 %v525_v55, %v522_v54  ;;  %p1126_p12 = pnand %p1125_p11, %p1119_p8 }
  0xad   :  { %v533_v12 = vmul.f32 %v1515_v48, %v532_v57  ;;  %v537_v15 = vmul.f32 %v1548_v14, %v536_v58  ;;  %v540_v16 = vstv %s1674_s8  ;;  %v544_v17 = vstv %s1676_s17 }
  0xae   :  { %v508_v13 = vadd.f32 %v507_v47, %v504_v60  ;;  %v530_v19 = vadd.f32 %v529_v7, %v526_v11  ;;  %v551_v61 = vsel %vm550_vm0, %v1654_v27, -inf  ;;  %v573_v20 = vsel %vm550_vm0, %v1662_v1, -inf }
  0xaf   :  { %v595_v21 = vsel %vm550_vm0, %v1678_v40, -inf  ;;  %v552_v23 = vrot.slane %v551_v61, 4  ;;  %v574_v24 = vrot.slane %v573_v20, 4  ;;  %v541_v28 = vmul.f32 %v1582_v37, %v540_v16 }
  0xb0   :  { %v512_v22 = vadd.f32 %v511_v3, %v508_v13  ;;  %v596_v25 = vrot.slane %v595_v21, 4  ;;  %v534_v26 = vadd.f32 %v533_v12, %v530_v19  ;;  %v617_v29 = vsel %vm550_vm0, %v1683_v44, -inf }
  0xb1   :  { %v639_v30 = vsel %vm550_vm0, %v1699_v9, -inf  ;;  %v553_v32 = vmax.f32 %v551_v61, %v552_v23  ;;  %v575_v33 = vmax.f32 %v573_v20, %v574_v24  ;;  %v545_v34 = vmul.f32 %v1621_v63, %v544_v17 }
  0xb2   :  { %v516_v31 = vadd.f32 %v515_v10, %v512_v22  ;;  %v597_v62 = vmax.f32 %v595_v21, %v596_v25  ;;  %v538_v4 = vadd.f32 %v537_v15, %v534_v26  ;;  %v618_v35 = vrot.slane %v617_v29, 4 }
  0xb3   :  { %v640_v36 = vrot.slane %v639_v30, 4  ;;  %v554_v38 = vrot.slane %v553_v32, 2  ;;  %v576_v39 = vrot.slane %v575_v33, 2  ;;  %v548_v43 = vstv %s1703_s18 }
  0xb4   :  { %v519_v5 = vadd.f32 %v518_v6, %v516_v31  ;;  %v598_v41 = vrot.slane %v597_v62, 2  ;;  %v542_v42 = vadd.f32 %v541_v28, %v538_v4  ;;  %v619_v45 = vmax.f32 %v617_v29, %v618_v35 }
  0xb5   :  { %v641_v46 = vmax.f32 %v639_v30, %v640_v36  ;;  %v555_v8 = vmax.f32 %v553_v32, %v554_v38  ;;  %v577_v47 = vmax.f32 %v575_v33, %v576_v39 }
  0xb6   :  { %v599_v49 = vmax.f32 %v597_v62, %v598_v41  ;;  %v661_v50 = vsel %vm550_vm0, %v519_v5, -inf  ;;  %v546_v51 = vadd.f32 %v545_v34, %v542_v42  ;;  %v620_v52 = vrot.slane %v619_v45, 2 }
  0xb7   :  { %v642_v18 = vrot.slane %v641_v46, 2  ;;  %v662_v53 = vrot.slane %v661_v50, 4  ;;  %v556_v54 = vrot.slane %v555_v8, 1  ;;  %v578_v55 = vrot.slane %v577_v47, 1 }
  0xb8   :  { %v600_v56 = vrot.slane %v599_v49, 1  ;;  %v549_v57 = vadd.f32 %v548_v43, %v546_v51  ;;  %v621_v58 = vmax.f32 %v619_v45, %v620_v52 }
  0xb9   :  { %v643_v60 = vmax.f32 %v641_v46, %v642_v18  ;;  %v663_v3 = vmax.f32 %v661_v50, %v662_v53  ;;  %v557_v6 = vmax.f32 %v555_v8, %v556_v54  ;;  %v579_v7 = vmax.f32 %v577_v47, %v578_v55 }
  0xba   :  { %v601_v10 = vmax.f32 %v599_v49, %v600_v56  ;;  %v622_v11 = vrot.slane %v621_v58, 1  ;;  %v683_v15 = vsel %vm550_vm0, %v549_v57, -inf }
  0xbb   :  { %v644_v12 = vrot.slane %v643_v60, 1  ;;  %v664_v13 = vrot.slane %v663_v3, 2  ;;  %v558_v16 = vsub.f32 %v1654_v27, %v557_v6  ;;  %v580_v17 = vsub.f32 %v1662_v1, %v579_v7 }
  0xbc   :  { %v602_v19 = vsub.f32 %v1678_v40, %v601_v10  ;;  %v684_v61 = vrot.slane %v683_v15, 4  ;;  %v623_v20 = vmax.f32 %v621_v58, %v622_v11 }
  0xbd   :  { %v645_v21 = vmax.f32 %v643_v60, %v644_v12  ;;  %v665_v22 = vmax.f32 %v663_v3, %v664_v13  ;;  %v559_v23 = vmul.f32 1.442695, %v558_v16  ;;  %v581_v24 = vmul.f32 1.442695, %v580_v17 }
  0xbe   :  { %v603_v25 = vmul.f32 1.442695, %v602_v19  ;;  %v685_v26 = vmax.f32 %v683_v15, %v684_v61  ;;  %v624_v28 = vsub.f32 %v1683_v44, %v623_v20 }
  0xbf   :  { %v646_v29 = vsub.f32 %v1699_v9, %v645_v21  ;;  %v666_v30 = vrot.slane %v665_v22, 1  ;;  %989 = vpow2.f32 %v559_v23 }
  0xc0   :  { %v686_v31 = vrot.slane %v685_v26, 2  ;;  %991 = vpow2.f32 %v581_v24  ;;  %v625_v27 = vmul.f32 1.442695, %v624_v28 }
  0xc1   :  { %v647_v1 = vmul.f32 1.442695, %v646_v29  ;;  %v667_v32 = vmax.f32 %v665_v22, %v666_v30  ;;  %993 = vpow2.f32 %v603_v25 }
  0xc2   :  { %v687_v40 = vmax.f32 %v685_v26, %v686_v31  ;;  %995 = vpow2.f32 %v625_v27 }
  0xc3   :  { %v668_v33 = vsub.f32 %v519_v5, %v667_v32  ;;  %997 = vpow2.f32 %v647_v1 }
  0xc4   :  { %v688_v62 = vrot.slane %v687_v40, 1 }
  0xc5   :  { %v669_v4 = vmul.f32 1.442695, %v668_v33 }
  0xc6   :  { %v689_v34 = vmax.f32 %v687_v40, %v688_v62 }
  0xc7   :  { %999 = vpow2.f32 %v669_v4 }
  0xc8   :  { %v690_v35 = vsub.f32 %v549_v57, %v689_v34 }
  0xc9   :  { %v1728_v44 = vpop.eup %989 }
  0xca   :  { %v691_v9 = vmul.f32 1.442695, %v690_v35  ;;  %v1730_v36 = vpop.eup %991  ;;  %v561_v38 = vsel %vm550_vm0, %v1728_v44, 0.0 }
  0xcb   :  { %v1734_v39 = vpop.eup %993  ;;  %v562_v41 = vrot.slane %v561_v38, 4  ;;  %v583_v5 = vsel %vm550_vm0, %v1730_v36, 0.0 }
  0xcc   :  { %1001 = vpow2.f32 %v691_v9  ;;  %v1738_v42 = vpop.eup %995  ;;  %v584_v43 = vrot.slane %v583_v5, 4  ;;  %v605_v45 = vsel %vm550_vm0, %v1734_v39, 0.0 }
  0xcd   :  { %v1742_v46 = vpop.eup %997  ;;  %v563_v8 = vadd.f32 %v562_v41, %v561_v38  ;;  %v606_v47 = vrot.slane %v605_v45, 4  ;;  %v627_v49 = vsel %vm550_vm0, %v1738_v42, 0.0 }
  0xce   :  { %v585_v50 = vadd.f32 %v584_v43, %v583_v5  ;;  %v628_v51 = vrot.slane %v627_v49, 4  ;;  %v649_v52 = vsel %vm550_vm0, %v1742_v46, 0.0 }
  0xcf   :  { %v564_v18 = vrot.slane %v563_v8, 2  ;;  %v607_v53 = vadd.f32 %v606_v47, %v605_v45  ;;  %v650_v54 = vrot.slane %v649_v52, 4 }
  0xd0   :  { %v586_v56 = vrot.slane %v585_v50, 2  ;;  %v629_v57 = vadd.f32 %v628_v51, %v627_v49 }
  0xd1   :  { %v1748_v55 = vpop.eup %999  ;;  %v565_v58 = vadd.f32 %v564_v18, %v563_v8  ;;  %v608_v60 = vrot.slane %v607_v53, 2  ;;  %v651_v3 = vadd.f32 %v650_v54, %v649_v52 }
  0xd2   :  { %v671_v6 = vsel %vm550_vm0, %v1748_v55, 0.0  ;;  %v587_v7 = vadd.f32 %v586_v56, %v585_v50  ;;  %v630_v10 = vrot.slane %v629_v57, 2 }
  0xd3   :  { %v672_v11 = vrot.slane %v671_v6, 4  ;;  %v566_v12 = vrot.slane %v565_v58, 1  ;;  %v609_v13 = vadd.f32 %v608_v60, %v607_v53  ;;  %v652_v15 = vrot.slane %v651_v3, 2 }
  0xd4   :  { %v588_v16 = vrot.slane %v587_v7, 1  ;;  %v631_v17 = vadd.f32 %v630_v10, %v629_v57 }
  0xd5   :  { %v673_v19 = vadd.f32 %v672_v11, %v671_v6  ;;  %v567_v20 = vadd.f32 %v566_v12, %v565_v58  ;;  %v610_v21 = vrot.slane %v609_v13, 1  ;;  %v653_v22 = vadd.f32 %v652_v15, %v651_v3 }
  0xd6   :  { %v1752_v61 = vpop.eup %1001  ;;  %v589_v23 = vadd.f32 %v588_v16, %v587_v7  ;;  %v632_v24 = vrot.slane %v631_v17, 1 }
  0xd7   :  { %v674_v25 = vrot.slane %v673_v19, 2  ;;  %v693_v26 = vsel %vm550_vm0, %v1752_v61, 0.0  ;;  %1003 = vrcp.f32 %v567_v20  ;;  %v611_v28 = vadd.f32 %v610_v21, %v609_v13 }
  0xd8   :  { %v654_v29 = vrot.slane %v653_v22, 1  ;;  %v694_v30 = vrot.slane %v693_v26, 4  ;;  %1005 = vrcp.f32 %v589_v23  ;;  %v633_v31 = vadd.f32 %v632_v24, %v631_v17 }
  0xd9   :  { %v675_v27 = vadd.f32 %v674_v25, %v673_v19  ;;  %1007 = vrcp.f32 %v611_v28 }
  0xda   :  { %v655_v1 = vadd.f32 %v654_v29, %v653_v22  ;;  %v695_v32 = vadd.f32 %v694_v30, %v693_v26  ;;  %1009 = vrcp.f32 %v633_v31 }
  0xdb   :  { %v676_v40 = vrot.slane %v675_v27, 1 }
  0xdc   :  { %1011 = vrcp.f32 %v655_v1  ;;  %v696_v33 = vrot.slane %v695_v32, 2 }
  0xdd   :  { %v677_v62 = vadd.f32 %v676_v40, %v675_v27  ;;  %v1020_v27 = vld [vmem:[#allocation2 + $0x8] sm:$0xff]  ;;  %v1022_v40 = vld [vmem:[#allocation2 + $0x18] sm:$0xff] }
  0xde   :  { %v697_v4 = vadd.f32 %v696_v33, %v695_v32 }
  0xdf   :  { %1013 = vrcp.f32 %v677_v62 }
  0xe0   :  { %v698_v34 = vrot.slane %v697_v4, 1 }
  0xe1   :  { %v1004_v35 = vpop.eup %1003 }
  0xe2   :  { %v699_v9 = vadd.f32 %v698_v34, %v697_v4  ;;  %v1006_v38 = vpop.eup %1005  ;;  %v569_v41 = vmul.f32 %v1004_v35, %v567_v20 }
  0xe3   :  { %v1008_v5 = vpop.eup %1007  ;;  %v591_v43 = vmul.f32 %v1006_v38, %v589_v23 }
  0xe4   :  { %1015 = vrcp.f32 %v699_v9  ;;  %v1010_v45 = vpop.eup %1009  ;;  %v570_v8 = vsub.f32 2.0, %v569_v41  ;;  %v613_v47 = vmul.f32 %v1008_v5, %v611_v28 }
  0xe5   :  { %v592_v50 = vsub.f32 2.0, %v591_v43  ;;  %v635_v51 = vmul.f32 %v1010_v45, %v633_v31  ;;  %v1019_v31 = vld [vmem:[#allocation2] sm:$0xff] }
  0xe6   :  { %v1012_v49 = vpop.eup %1011  ;;  %v571_v52 = vmul.f32 %v1004_v35, %v570_v8  ;;  %v614_v18 = vsub.f32 2.0, %v613_v47 }
  0xe7   :  { %v657_v53 = vmul.f32 %v1012_v49, %v655_v1  ;;  %v593_v54 = vmul.f32 %v1006_v38, %v592_v50  ;;  %v636_v56 = vsub.f32 2.0, %v635_v51 }
  0xe8   :  { %v572_v58 = vmul.f32 %v1728_v44, %v571_v52  ;;  %v615_v60 = vmul.f32 %v1008_v5, %v614_v18 }
  0xe9   :  { %v1014_v57 = vpop.eup %1013  ;;  %v658_v3 = vsub.f32 2.0, %v657_v53  ;;  %v594_v6 = vmul.f32 %v1730_v36, %v593_v54  ;;  %v637_v7 = vmul.f32 %v1010_v45, %v636_v56 }
  0xea   :  { %v679_v10 = vmul.f32 %v1014_v57, %v677_v62  ;;  %v616_v11 = vmul.f32 %v1734_v39, %v615_v60  ;;  %v705_v13 = vmul.f32 %v1436_v59, %v572_v58 }
  0xeb   :  { %v659_v12 = vmul.f32 %v1012_v49, %v658_v3  ;;  %v638_v15 = vmul.f32 %v1738_v42, %v637_v7  ;;  %v706_v17 = vmul.f32 %v1472_v0, %v594_v6 }
  0xec   :  { %v680_v16 = vsub.f32 2.0, %v679_v10  ;;  %v708_v44 = vmul.f32 %v1484_v2, %v616_v11 }
  0xed   :  { %v660_v19 = vmul.f32 %v1742_v46, %v659_v12  ;;  %v707_v22 = vadd.f32 %v706_v17, %v705_v13  ;;  %v710_v36 = vmul.f32 %v1515_v48, %v638_v15 }
  0xee   :  { %v1016_v20 = vpop.eup %1015  ;;  %v681_v21 = vmul.f32 %v1014_v57, %v680_v16 }
  0xef   :  { %v701_v23 = vmul.f32 %v1016_v20, %v699_v9  ;;  %v709_v24 = vadd.f32 %v708_v44, %v707_v22  ;;  %v712_v59 = vmul.f32 %v1548_v14, %v660_v19  ;;  %v1024_v9 = vld [vmem:[#allocation2 + $0x28] sm:$0xff] }
  0xf0   :  { %v682_v39 = vmul.f32 %v1748_v55, %v681_v21  ;;  %v1021_v55 = vld [vmem:[#allocation2 + $0x10] sm:$0xff] }
  0xf1   :  { %v702_v25 = vsub.f32 2.0, %v701_v23  ;;  %v711_v42 = vadd.f32 %v710_v36, %v709_v24  ;;  %v764_v36 = vstv %s1770_s6  ;;  %v767_v23 = vstv %s1776_s23 }
  0xf2   :  { %v714_v26 = vmul.f32 %v1582_v37, %v682_v39  ;;  %v1023_v37 = vld [vmem:[#allocation2 + $0x20] sm:$0xff]  ;;  %v772_v39 = vstv %s1772_s21  ;;  %v775_v24 = vstv %s1780_s25 }
  0xf3   :  { %v703_v0 = vmul.f32 %v1016_v20, %v702_v25  ;;  %v713_v28 = vadd.f32 %v712_v59, %v711_v42  ;;  %v781_v59 = vstv %s1774_s22  ;;  %v784_v25 = vstv %s1782_s26 }
  0xf4   :  { %v790_v42 = vstv %s1778_s24 }
  0xf5   :  { %v704_v46 = vmul.f32 %v1752_v61, %v703_v0  ;;  %v715_v2 = vadd.f32 %v714_v26, %v713_v28  ;;  %v793_v26 = vstv %s1784_s27  ;;  %v799_v0 = vstv %s1786_s28 }
  0xf7   :  { %v716_v29 = vmul.f32 %v1621_v63, %v704_v46  ;;  %v1025_v63 = vld [vmem:[#allocation2 + $0x30] sm:$0xff]  ;;  %v802_v46 = vstv %s1788_s29 }
  0xf9   :  { %v717_v30 = vadd.f32 %v716_v29, %v715_v2  ;;  %v808_v2 = vstv %s1790_s9  ;;  %v811_v29 = vstv %s1792_s0 }
  0xfb   :  { %v718_v48 = vmul.f32 %v1019_v31, %v717_v30  ;;  %v720_v1 = vmul.f32 %v1020_v27, %v717_v30  ;;  %v722_v32 = vmul.f32 %v1021_v55, %v717_v30  ;;  %v724_v14 = vmul.f32 %v1022_v40, %v717_v30 }
  0xfc   :  { %v726_v34 = vmul.f32 %v1023_v37, %v717_v30  ;;  %v728_v61 = vmul.f32 %v1024_v9, %v717_v30  ;;  %v730_v5 = vmul.f32 %v1025_v63, %v717_v30  ;;  %v817_v30 = vstv %s1794_s3 }
  0xfd   :  { %v719_v33 = vadd.f32 %v1019_v31, %v718_v48  ;;  %v721_v62 = vadd.f32 %v1020_v27, %v720_v1  ;;  %v723_v4 = vadd.f32 %v1021_v55, %v722_v32  ;;  %v725_v35 = vadd.f32 %v1022_v40, %v724_v14 }
  0xfe   :  { %v727_v41 = vadd.f32 %v1023_v37, %v726_v34  ;;  %v729_v45 = vadd.f32 %v1024_v9, %v728_v61  ;;  %v731_v47 = vadd.f32 %v1025_v63, %v730_v5  ;;  %v820_v14 = vstv %s1796_s5 }
  0xff   :  { %v732_v38 = vadd.f32 %v721_v62, %v719_v33 }
 0x101   :  { %v733_v43 = vadd.f32 %v732_v38, %v723_v4 }
 0x103   :  { %v734_v8 = vadd.f32 %v733_v43, %v725_v35 }
 0x105   :  { %v735_v49 = vadd.f32 %v734_v8, %v727_v41 }
 0x107   :  { %v736_v50 = vadd.f32 %v735_v49, %v729_v45 }
 0x109   :  { %v737_v51 = vadd.f32 %v736_v50, %v731_v47 }
 0x10b   :  { %v738_v52 = vmul.f32 0.14285715, %v737_v51 }
 0x10d   :  { %v739_v18 = vsub.f32 %v719_v33, %v738_v52  ;;  %v741_v53 = vsub.f32 %v721_v62, %v738_v52  ;;  %v744_v54 = vsub.f32 %v723_v4, %v738_v52  ;;  %v747_v56 = vsub.f32 %v725_v35, %v738_v52 }
 0x10e   :  { %v750_v3 = vsub.f32 %v727_v41, %v738_v52  ;;  %v753_v10 = vsub.f32 %v729_v45, %v738_v52  ;;  %v756_v13 = vsub.f32 %v731_v47, %v738_v52 }
 0x10f   :  { %v740_v57 = vmul.f32 %v739_v18, %v739_v18  ;;  %v742_v58 = vmul.f32 %v741_v53, %v741_v53  ;;  %v745_v60 = vmul.f32 %v744_v54, %v744_v54  ;;  %v748_v7 = vmul.f32 %v747_v56, %v747_v56 }
 0x110   :  { %v751_v12 = vmul.f32 %v750_v3, %v750_v3  ;;  %v754_v16 = vmul.f32 %v753_v10, %v753_v10  ;;  %v757_v19 = vmul.f32 %v756_v13, %v756_v13 }
 0x111   :  { %v743_v6 = vadd.f32 %v742_v58, %v740_v57 }
 0x113   :  { %v746_v11 = vadd.f32 %v745_v60, %v743_v6 }
 0x115   :  { %v749_v15 = vadd.f32 %v748_v7, %v746_v11 }
 0x117   :  { %v752_v17 = vadd.f32 %v751_v12, %v749_v15 }
 0x119   :  { %v755_v44 = vadd.f32 %v754_v16, %v752_v17 }
 0x11b   :  { %v758_v20 = vadd.f32 %v757_v19, %v755_v44 }
 0x11d   :  { %v759_v21 = vmul.f32 0.14285715, %v758_v20 }
 0x11f   :  { %v760_v22 = vadd.f32 1e-05, %v759_v21 }
 0x121   :  { %1017 = vrsqrt.f32 %v760_v22 }
 0x12b   :  { %v1018_v28 = vpop.eup %1017 }
 0x12c   :  { %v762_v31 = vmul.f32 %v1018_v28, %v739_v18  ;;  %v770_v48 = vmul.f32 %v1018_v28, %v741_v53  ;;  %v779_v27 = vmul.f32 %v1018_v28, %v744_v54  ;;  %v788_v1 = vmul.f32 %v1018_v28, %v747_v56 }
 0x12d   :  { %v797_v55 = vmul.f32 %v1018_v28, %v750_v3  ;;  %v806_v32 = vmul.f32 %v1018_v28, %v753_v10  ;;  %v815_v40 = vmul.f32 %v1018_v28, %v756_v13 }
 0x12e   :  { %v765_v33 = vmul.f32 %v764_v36, %v762_v31  ;;  %v773_v62 = vmul.f32 %v772_v39, %v770_v48  ;;  %v782_v4 = vmul.f32 %v781_v59, %v779_v27  ;;  %v791_v37 = vmul.f32 %v790_v42, %v788_v1 }
 0x12f   :  { %v800_v34 = vmul.f32 %v799_v0, %v797_v55  ;;  %v809_v35 = vmul.f32 %v808_v2, %v806_v32  ;;  %v818_v9 = vmul.f32 %v817_v30, %v815_v40 }
 0x130   :  { %v768_v61 = vadd.f32 %v767_v23, %v765_v33  ;;  %v776_v38 = vadd.f32 %v775_v24, %v773_v62  ;;  %v785_v41 = vadd.f32 %v784_v25, %v782_v4  ;;  %v794_v63 = vadd.f32 %v793_v26, %v791_v37 }
 0x131   :  { %v803_v5 = vadd.f32 %v802_v46, %v800_v34  ;;  %v812_v43 = vadd.f32 %v811_v29, %v809_v35  ;;  %v821_v45 = vadd.f32 %v820_v14, %v818_v9 }
 0x132   :  { %769 = vst.msk [vmem:[#allocation15] sm:$0xff] %vm550_vm0, %v768_v61  ;;  %778 = vst.msk [vmem:[#allocation15 + $0x8] sm:$0xff] %vm550_vm0, %v776_v38 }
 0x133   :  { %787 = vst.msk [vmem:[#allocation15 + $0x10] sm:$0xff] %vm550_vm0, %v785_v41  ;;  %796 = vst.msk [vmem:[#allocation15 + $0x18] sm:$0xff] %vm550_vm0, %v794_v63 }
 0x134   :  { %805 = vst.msk [vmem:[#allocation15 + $0x20] sm:$0xff] %vm550_vm0, %v803_v5  ;;  %814 = vst.msk [vmem:[#allocation15 + $0x28] sm:$0xff] %vm550_vm0, %v812_v43 }
 0x135   :  { %823 = vst.msk [vmem:[#allocation15 + $0x30] sm:$0xff] %vm550_vm0, %v821_v45 }
 0x136   :  { %1129 = shalt.err (!%p1126_p12)
}
 0x137   :  { %s1130_s14 = scalar_lea.hbm %s1841_s7, 896 }
 0x138   :  { %p1131_p13 = scmp.ne.s32.totalorder %s1841_s7, %s1130_s14  ;;  %p1134_p0 = scmp.lt.u32.totalorder %s1130_s14, %s1841_s7 }
 0x13a   :  { %p1136_p1 = pnand %p1134_p0, %p1131_p13 }
 0x13c   :  { %1139 = shalt.err (!%p1136_p1)
}
 0x13d   :  { %835 = dma.vmem_to_hbm [thread:$0]  %s830_s11, 896, %s1841_s7, [#allocation4], %s1155_s19, %s1155_s19, %s1156_s20  }
 0x13e   :  { %1150 = dma.done.wait [#allocation4], 896  }
 0x13f   :  { %1151 = vsyncadd [#allocation4], 4294966400 }
 0x140   :  { %839 = vsyncpa [#allocation3], 1 }
 0x141   :  { %840 = vsyncpa [#allocation4], 1 }
 0x142   :  { %841 = vsyncpa [#allocation5], 1 }
 0x143   :  { %842 = vsyncpa [#allocation6], 1 }
 0x144   :  { %843 = vsyncpa [#allocation10], 1 }
 0x145   :  { %844 = vsyncpa [#allocation13], 1 }

</bundles_post_ra>
